<compile_context>
chip_gen: v6e
topology: v6e:2x2x1
jax: 0.10.0
libtpu: 0.0.40
codegen_flags: <defaults>
</compile_context>

<pallas_src>
import functools

import jax
import jax.numpy as jnp
import numpy as np
from jax import lax
from jax.experimental import pallas as pl
from jax.experimental.pallas import tpu as pltpu

MATMUL_DTYPE = jnp.bfloat16   # MXU operand dtype; accumulation stays f32
ACT_DTYPE = jnp.bfloat16      # inter-kernel activation dtype
RMS_EPS = 1e-12               # keeps an all-zero block finite (reference has no eps)


# ----------------------------------------------------------------------------
# RoPE tables (rotate-half form, keeps the reference's (i-1) exponent quirk)
# ----------------------------------------------------------------------------
def rope_tables(context_window, d):
    i = np.arange(d // 2, dtype=np.float64)
    theta = 10000.0 ** (-2.0 * (i - 1) / d)          # (i-1) quirk preserved
    ang = np.arange(context_window, dtype=np.float64)[:, None] * theta[None, :]
    cos = np.cos(ang).astype(np.float32)
    sin = np.sin(ang).astype(np.float32)
    cos_full = np.concatenate([cos, cos], axis=-1)   # (cw, d)
    sin_full = np.concatenate([sin, -sin], axis=-1)  # (cw, d)
    return jnp.asarray(cos_full), jnp.asarray(sin_full)


def rope_perm(d):
    # column permutation so q/k come out as [even dims..., odd dims...]
    return np.concatenate([np.arange(0, d, 2), np.arange(1, d, 2)])


def _pick_tile(dim, candidates):
    """Largest candidate < dim that divides it; for big awkward dims try any
    128-aligned divisor before falling back to the full dimension."""
    for c in candidates:
        if c < dim and dim % c == 0:
            return c
    if dim > candidates[0]:
        for c in range(candidates[0], 127, -128):
            if dim % c == 0:
                return c
        # TODO(synk): pad ragged large dims to a multiple of 128 instead of using a
        # full-dimension block (VMEM risk on v7x first).
    return dim


# ----------------------------------------------------------------------------
# Tiled linear: y = x @ W + b  (used for the final logits projection)
# ----------------------------------------------------------------------------
def _linear_kernel(x_ref, w_ref, b_ref, o_ref, acc_ref):
    @pl.when(pl.program_id(2) == 0)
    def _():
        acc_ref[...] = jnp.zeros_like(acc_ref)

    acc_ref[...] += jnp.dot(
        x_ref[...].astype(MATMUL_DTYPE),
        w_ref[...].astype(MATMUL_DTYPE),
        preferred_element_type=jnp.float32,
    )

    @pl.when(pl.program_id(2) == pl.num_programs(2) - 1)
    def _():
        o_ref[...] = (acc_ref[...] + b_ref[...]).astype(o_ref.dtype)


def pallas_linear(x, w, b, out_dtype=jnp.float32):
    orig_shape = x.shape
    din, dout = w.shape
    x2 = x.reshape(-1, din)
    n = x2.shape[0]
    tm = _pick_tile(n, (512, 256, 128, 64, 32, 16, 8))
    tn = _pick_tile(dout, (1024, 512, 256, 128))
    tk = _pick_tile(din, (1024, 512, 256, 128))
    grid = (n // tm, dout // tn, din // tk)
    cost = pl.CostEstimate(
        flops=int(2 * n * dout * din),
        transcendentals=0,
        bytes_accessed=int(x2.size * x2.dtype.itemsize
                           + w.size * w.dtype.itemsize
                           + b.size * b.dtype.itemsize
                           + n * dout * jnp.dtype(out_dtype).itemsize),
    )
    out = pl.pallas_call(
        _linear_kernel,
        grid=grid,
        in_specs=[
            pl.BlockSpec((tm, tk), lambda i, j, k: (i, k)),
            pl.BlockSpec((tk, tn), lambda i, j, k: (k, j)),
            pl.BlockSpec((1, tn), lambda i, j, k: (0, j)),
        ],
        out_specs=pl.BlockSpec((tm, tn), lambda i, j, k: (i, j)),
        out_shape=jax.ShapeDtypeStruct((n, dout), out_dtype),
        scratch_shapes=[pltpu.VMEM((tm, tn), jnp.float32)],
        compiler_params=pltpu.CompilerParams(
            dimension_semantics=("parallel", "parallel", "arbitrary")),
        cost_estimate=cost,
    )(x2, w, b.reshape(1, dout))
    return out.reshape(orig_shape[:-1] + (dout,))


# ----------------------------------------------------------------------------
# Fused: RMSNorm -> per-head (QKV + RoPE + causal attention) -> wo proj -> residual
# Grid (batch, head); head axis accumulates attn_h @ wo[h] into a VMEM accumulator.
# ----------------------------------------------------------------------------
def _mha_block_kernel(x_ref, wqkv_ref, wo_ref, bo_ref, cos_ref, sin_ref,
                      scale_ref, o_ref, x1_ref, acc_ref, *, n_heads, head_dim):
    h = pl.program_id(1)
    dh = head_dim
    half = dh // 2

    @pl.when(h == 0)
    def _():
        x = x_ref[...].astype(jnp.float32)
        mean_sq = jnp.mean(x * x)                     # RMSNorm over the whole (M, D)
        x1_ref[...] = scale_ref[...] * (x * lax.rsqrt(mean_sq + RMS_EPS))
        acc_ref[...] = jnp.zeros_like(acc_ref)

    x1b = x1_ref[...].astype(MATMUL_DTYPE)

    # per-head QKV projection: (M, D) @ (D, 3*Dh), weight already bf16
    qkv = jnp.dot(x1b, wqkv_ref[...], preferred_element_type=jnp.float32)
    q, k, v = qkv[:, :dh], qkv[:, dh:2 * dh], qkv[:, 2 * dh:]

    cos = cos_ref[...]
    sin = sin_ref[...]

    def rope(t):
        # [even, odd] column layout; rotate-half form of the reference rotary matrix.
        # TODO(synk): use pltpu.roll(t, half, axis=-1) once Dh is a lane multiple.
        swapped = jnp.concatenate([t[:, half:], t[:, :half]], axis=-1)
        return t * cos + swapped * sin

    q_rot, k_rot = rope(q), rope(k)

    m = q.shape[0]
    s = lax.dot_general(
        q_rot.astype(MATMUL_DTYPE), k_rot.astype(MATMUL_DTYPE),
        (((1,), (1,)), ((), ())), preferred_element_type=jnp.float32,
    ) * (1.0 / (dh ** 0.5))
    row = lax.broadcasted_iota(jnp.int32, (m, m), 0)
    col = lax.broadcasted_iota(jnp.int32, (m, m), 1)
    s = jnp.where(col <= row, s, -1e30)               # causal mask
    s = s - jnp.max(s, axis=-1, keepdims=True)
    p = jnp.exp(s)
    p = p / jnp.sum(p, axis=-1, keepdims=True)
    # TODO(synk): SDPA dropout_p=0.1 -> identity (eval semantics)

    pv = jnp.dot(p.astype(MATMUL_DTYPE), v.astype(MATMUL_DTYPE),
                 preferred_element_type=jnp.float32)  # (M, Dh)

    # fused output projection: accumulate this head's contribution to (M, D)
    acc_ref[...] += jnp.dot(pv.astype(MATMUL_DTYPE), wo_ref[...],
                            preferred_element_type=jnp.float32)

    @pl.when(h == n_heads - 1)
    def _():
        # bias + residual onto the normed input (x = rms(x); x = x + attention(x));
        # post-projection dropout(0.1) -> identity (eval semantics)
        o_ref[...] = (x1_ref[...] + acc_ref[...] + bo_ref[...]).astype(o_ref.dtype)


def pallas_mha_block(x, wqkv, wo, bo, cos, sin, rms_scale, n_heads):
    bsz, m, d = x.shape
    dh = wqkv.shape[2] // 3
    kern = functools.partial(_mha_block_kernel, n_heads=n_heads, head_dim=dh)
    flops = 2 * bsz * n_heads * (m * d * 3 * dh + 2 * m * m * dh + m * dh * d)
    cost = pl.CostEstimate(
        flops=int(flops),
        transcendentals=int(bsz * n_heads * m * m),
        bytes_accessed=int(x.size * x.dtype.itemsize
                           + wqkv.size * wqkv.dtype.itemsize
                           + wo.size * wo.dtype.itemsize
                           + bsz * m * d * jnp.dtype(ACT_DTYPE).itemsize),
    )
    return pl.pallas_call(
        kern,
        grid=(bsz, n_heads),
        in_specs=[
            pl.BlockSpec((None, m, d), lambda i, h: (i, 0, 0)),        # x (per batch)
            pl.BlockSpec((None, d, 3 * dh), lambda i, h: (h, 0, 0)),   # wqkv (per head)
            pl.BlockSpec((None, dh, d), lambda i, h: (h, 0, 0)),       # wo row-block
            pl.BlockSpec((1, d), lambda i, h: (0, 0)),                 # bo
            pl.BlockSpec((m, dh), lambda i, h: (0, 0)),                # cos
            pl.BlockSpec((m, dh), lambda i, h: (0, 0)),                # sin
            pl.BlockSpec((m, d), lambda i, h: (0, 0)),                 # rms scale
        ],
        out_specs=pl.BlockSpec((None, m, d), lambda i, h: (i, 0, 0)),
        out_shape=jax.ShapeDtypeStruct((bsz, m, d), ACT_DTYPE),
        scratch_shapes=[pltpu.VMEM((m, d), jnp.float32),   # x1 (normed input)
                        pltpu.VMEM((m, d), jnp.float32)],  # output accumulator
        compiler_params=pltpu.CompilerParams(
            dimension_semantics=("parallel", "arbitrary")),
        cost_estimate=cost,
    )(x, wqkv, wo, bo.reshape(1, d), cos[:m], sin[:m], rms_scale[:m])


# ----------------------------------------------------------------------------
# Fused: [optional RMSNorm] -> Linear(d,d) -> SwiGLU(d) -> [optional residual]
# ----------------------------------------------------------------------------
def _ff_swiglu_kernel(x_ref, scale_ref, w1_ref, b1_ref, wg_ref, bg_ref,
                      w_ref, b_ref, beta_ref, o_ref, *, fuse_norm_residual):
    x = x_ref[...].astype(jnp.float32)
    if fuse_norm_residual:
        mean_sq = jnp.mean(x * x)                     # RMSNorm over the whole (M, D)
        x = scale_ref[...] * (x * lax.rsqrt(mean_sq + RMS_EPS))
    xb = x.astype(MATMUL_DTYPE)
    hid = jnp.dot(xb, w1_ref[...], preferred_element_type=jnp.float32) + b1_ref[...]
    hb = hid.astype(MATMUL_DTYPE)
    g = jnp.dot(hb, wg_ref[...], preferred_element_type=jnp.float32) + bg_ref[...]
    lin = jnp.dot(hb, w_ref[...], preferred_element_type=jnp.float32) + b_ref[...]
    beta = beta_ref[0]
    y = (g * jax.nn.sigmoid(beta * g)) * lin
    if fuse_norm_residual:
        y = x + y                                     # residual onto the normed input
    o_ref[...] = y.astype(o_ref.dtype)


def pallas_ff_swiglu(x, rms_scale, w1, b1, wg, bg, w, b, beta, *,
                     fuse_norm_residual, out_dtype=ACT_DTYPE):
    bsz, m, d = x.shape
    if fuse_norm_residual:
        scale_in = rms_scale[:m, :]
        scale_spec = pl.BlockSpec((m, d), lambda i: (0, 0))
    else:
        scale_in = jnp.zeros((1, 1), jnp.float32)     # placeholder, never read
        scale_spec = pl.BlockSpec((1, 1), lambda i: (0, 0))
    kern = functools.partial(_ff_swiglu_kernel, fuse_norm_residual=fuse_norm_residual)
    cost = pl.CostEstimate(
        flops=int(bsz * 3 * 2 * m * d * d),
        transcendentals=int(bsz * m * d),
        bytes_accessed=int(x.size * x.dtype.itemsize
                           + 3 * w1.size * w1.dtype.itemsize
                           + bsz * m * d * jnp.dtype(out_dtype).itemsize),
    )
    # TODO(synk): K/N-tile the three (d, d) weights with an f32 accumulator for large
    # d_model so they need not all be VMEM-resident (v7x 64 MiB ceiling).
    return pl.pallas_call(
        kern,
        grid=(bsz,),
        in_specs=[
            pl.BlockSpec((None, m, d), lambda i: (i, 0, 0)),
            scale_spec,
            pl.BlockSpec((d, d), lambda i: (0, 0)),
            pl.BlockSpec((1, d), lambda i: (0, 0)),
            pl.BlockSpec((d, d), lambda i: (0, 0)),
            pl.BlockSpec((1, d), lambda i: (0, 0)),
            pl.BlockSpec((d, d), lambda i: (0, 0)),
            pl.BlockSpec((1, d), lambda i: (0, 0)),
            pl.BlockSpec(memory_space=pltpu.MemorySpace.SMEM),  # beta scalar
        ],
        out_specs=pl.BlockSpec((None, m, d), lambda i: (i, 0, 0)),
        out_shape=jax.ShapeDtypeStruct((bsz, m, d), out_dtype),
        compiler_params=pltpu.CompilerParams(dimension_semantics=("parallel",)),
        cost_estimate=cost,
    )(x, scale_in, w1, b1.reshape(1, d), wg, bg.reshape(1, d), w, b.reshape(1, d),
      beta)


# ----------------------------------------------------------------------------
# Parameters + model composition
# ----------------------------------------------------------------------------
def init_params(key, cfg):
    d = cfg["d_model"]
    H = cfg["n_heads"]
    V = cfg["vocab_size"]
    cw = cfg["context_window"]

    keys = iter(jax.random.split(key, 4096))

    def dense(din, dout, dtype=MATMUL_DTYPE):
        w = 0.02 * jax.random.normal(next(keys), (din, dout), jnp.float32)
        return w.astype(dtype)

    def bias(dout):
        return 0.02 * jax.random.normal(next(keys), (dout,), jnp.float32)

    def swiglu_params(size):
        return dict(wg=dense(size, size), bg=bias(size),
                    w=dense(size, size), b=bias(size),
                    beta=jnp.ones((1,), jnp.float32))

    perm = rope_perm(d)
    blocks = []
    for _ in range(cfg["n_layers"]):
        # per head: [wq | wk | wv] stacked on the output axis; wq/wk columns are
        # pre-permuted to [even, odd] order to match the rotate-half RoPE form.
        per_head = []
        for _h in range(H):
            wq = dense(d, d, jnp.float32)[:, perm]
            wk = dense(d, d, jnp.float32)[:, perm]
            wv = dense(d, d, jnp.float32)
            per_head.append(jnp.concatenate([wq, wk, wv], axis=1))
        wqkv = jnp.stack(per_head, axis=0).astype(MATMUL_DTYPE)   # (H, d, 3d)
        wo = dense(H * d, d, jnp.float32).reshape(H, d, d).astype(MATMUL_DTYPE)
        blocks.append(dict(
            rms_scale=jnp.ones((cw, d), jnp.float32),
            wqkv=wqkv, wo=wo, bo=bias(d),
            ff_w=dense(d, d), ff_b=bias(d),
            ff_swiglu=swiglu_params(d),
        ))

    cos, sin = rope_tables(cw, d)
    emb = (0.02 * jax.random.normal(next(keys), (V, d), jnp.float32)).astype(ACT_DTYPE)
    return dict(
        emb=emb,
        blocks=blocks,
        ffn_w1=dense(d, d), ffn_b1=bias(d),
        ffn_swiglu=swiglu_params(d),
        ffn_wout=dense(d, V), ffn_bout=bias(V),
        rope_cos=cos, rope_sin=sin,
    )


def llama_block(blk, x, cos, sin, n_heads):
    # x -> rms -> x + attention(x)   (one fused kernel)
    x = pallas_mha_block(x, blk["wqkv"], blk["wo"], blk["bo"], cos, sin,
                         blk["rms_scale"], n_heads)
    # x -> rms -> x + feedforward(x) (one fused kernel: Linear(d,d) + SwiGLU)
    sg = blk["ff_swiglu"]
    x = pallas_ff_swiglu(x, blk["rms_scale"], blk["ff_w"], blk["ff_b"],
                         sg["wg"], sg["bg"], sg["w"], sg["b"], sg["beta"],
                         fuse_norm_residual=True)
    return x


def llama_forward(params, idx, cfg):
    x = params["emb"][idx]                          # (B, M, D) bf16 gather (glue)
    cos, sin = params["rope_cos"], params["rope_sin"]
    for blk in params["blocks"]:
        x = llama_block(blk, x, cos, sin, cfg["n_heads"])
    # final ffn: Linear(d,d) -> SwiGLU -> Linear(d, vocab)   (no norm / no residual)
    sg = params["ffn_swiglu"]
    x = pallas_ff_swiglu(x, None, params["ffn_w1"], params["ffn_b1"],
                         sg["wg"], sg["bg"], sg["w"], sg["b"], sg["beta"],
                         fuse_norm_residual=False)
    logits = pallas_linear(x, params["ffn_wout"], params["ffn_bout"],
                           out_dtype=jnp.float32)
    return logits


if __name__ == "__main__":
    config = {
        "vocab_size": 64,
        "d_model": 32,
        "n_heads": 2,
        "n_layers": 2,
        "context_window": 16,
    }
    batch, seq = 2, 8

    key = jax.random.PRNGKey(0)
    pkey, ikey = jax.random.split(key)
    params = init_params(pkey, config)
    idx = jax.random.randint(ikey, (batch, seq), 0, config["vocab_size"],
                             dtype=jnp.int32)

    fwd = jax.jit(functools.partial(llama_forward, cfg=config))
    logits = jax.block_until_ready(fwd(params, idx))

    assert logits.shape == (batch, seq, config["vocab_size"])
    assert bool(jnp.all(jnp.isfinite(logits)))
    print("KERNEL_OK")
</pallas_src>

<mosaic_0001>
module attributes {stable_mosaic.version = 11 : i64} {
  func.func @_ff_swiglu_kernel(%arg0: i32, %arg1: memref<1x8x32xbf16, #tpu.memory_space<vmem>>, %arg2: memref<1x1xf32, #tpu.memory_space<vmem>>, %arg3: memref<32x32xbf16, #tpu.memory_space<vmem>>, %arg4: memref<1x32xf32, #tpu.memory_space<vmem>>, %arg5: memref<32x32xbf16, #tpu.memory_space<vmem>>, %arg6: memref<1x32xf32, #tpu.memory_space<vmem>>, %arg7: memref<32x32xbf16, #tpu.memory_space<vmem>>, %arg8: memref<1x32xf32, #tpu.memory_space<vmem>>, %arg9: memref<1xf32, #tpu.memory_space<smem>>, %arg10: memref<1x8x32xbf16, #tpu.memory_space<vmem>>) attributes {dimension_semantics = [#tpu.dimension_semantics<parallel>], iteration_bounds = array<i64: 2>, scalar_prefetch = 0 : i64, scratch_operands = 0 : i64, tpu.core_type = #tpu.core_type<tc>, window_params = [{transform_indices = @transform_0, window_bounds = array<i64: 1, 8, 32>}, {pipeline_mode = #tpu.pipeline_mode<synchronous>, transform_indices = @transform_1, window_bounds = array<i64: 1, 1>}, {pipeline_mode = #tpu.pipeline_mode<synchronous>, transform_indices = @transform_2, window_bounds = array<i64: 32, 32>}, {pipeline_mode = #tpu.pipeline_mode<synchronous>, transform_indices = @transform_3, window_bounds = array<i64: 1, 32>}, {pipeline_mode = #tpu.pipeline_mode<synchronous>, transform_indices = @transform_4, window_bounds = array<i64: 32, 32>}, {pipeline_mode = #tpu.pipeline_mode<synchronous>, transform_indices = @transform_5, window_bounds = array<i64: 1, 32>}, {pipeline_mode = #tpu.pipeline_mode<synchronous>, transform_indices = @transform_6, window_bounds = array<i64: 32, 32>}, {pipeline_mode = #tpu.pipeline_mode<synchronous>, transform_indices = @transform_7, window_bounds = array<i64: 1, 32>}, {transform_indices = @transform_8, window_bounds = array<i64: 1>}, {transform_indices = @transform_9, window_bounds = array<i64: 1, 8, 32>}]} {
    %c0 = arith.constant 0 : index
    %c0_0 = arith.constant 0 : index
    %c0_1 = arith.constant 0 : index
    %0 = vector.load %arg1[%c0, %c0_0, %c0_1] : memref<1x8x32xbf16, #tpu.memory_space<vmem>>, vector<1x8x32xbf16>
    %1 = vector.shape_cast %0 : vector<1x8x32xbf16> to vector<8x32xbf16>
    %2 = arith.extf %1 : vector<8x32xbf16> to vector<8x32xf32>
    %3 = arith.truncf %2 : vector<8x32xf32> to vector<8x32xbf16>
    %c0_2 = arith.constant 0 : index
    %c0_3 = arith.constant 0 : index
    %4 = vector.load %arg3[%c0_2, %c0_3] : memref<32x32xbf16, #tpu.memory_space<vmem>>, vector<32x32xbf16>
    %cst = arith.constant dense<0.000000e+00> : vector<8x32xf32>
    %5 = tpu.matmul %3, %4, %cst {dimension_numbers = #tpu.dot_dimension_numbers<[1], [0], [0], [1], [0, 0, 1, 1], [], []>} : vector<8x32xbf16>, vector<32x32xbf16>, vector<8x32xf32> -> vector<8x32xf32>
    %c0_4 = arith.constant 0 : index
    %c0_5 = arith.constant 0 : index
    %6 = vector.load %arg4[%c0_4, %c0_5] : memref<1x32xf32, #tpu.memory_space<vmem>>, vector<1x32xf32>
    %7 = vector.broadcast %6 : vector<1x32xf32> to vector<8x32xf32>
    %8 = arith.addf %5, %7 : vector<8x32xf32>
    %9 = arith.truncf %8 : vector<8x32xf32> to vector<8x32xbf16>
    %c0_6 = arith.constant 0 : index
    %c0_7 = arith.constant 0 : index
    %10 = vector.load %arg5[%c0_6, %c0_7] : memref<32x32xbf16, #tpu.memory_space<vmem>>, vector<32x32xbf16>
    %cst_8 = arith.constant dense<0.000000e+00> : vector<8x32xf32>
    %11 = tpu.matmul %9, %10, %cst_8 {dimension_numbers = #tpu.dot_dimension_numbers<[1], [0], [0], [1], [0, 0, 1, 1], [], []>} : vector<8x32xbf16>, vector<32x32xbf16>, vector<8x32xf32> -> vector<8x32xf32>
    %c0_9 = arith.constant 0 : index
    %c0_10 = arith.constant 0 : index
    %12 = vector.load %arg6[%c0_9, %c0_10] : memref<1x32xf32, #tpu.memory_space<vmem>>, vector<1x32xf32>
    %13 = vector.broadcast %12 : vector<1x32xf32> to vector<8x32xf32>
    %14 = arith.addf %11, %13 : vector<8x32xf32>
    %c0_11 = arith.constant 0 : index
    %c0_12 = arith.constant 0 : index
    %15 = vector.load %arg7[%c0_11, %c0_12] : memref<32x32xbf16, #tpu.memory_space<vmem>>, vector<32x32xbf16>
    %cst_13 = arith.constant dense<0.000000e+00> : vector<8x32xf32>
    %16 = tpu.matmul %9, %15, %cst_13 {dimension_numbers = #tpu.dot_dimension_numbers<[1], [0], [0], [1], [0, 0, 1, 1], [], []>} : vector<8x32xbf16>, vector<32x32xbf16>, vector<8x32xf32> -> vector<8x32xf32>
    %c0_14 = arith.constant 0 : index
    %c0_15 = arith.constant 0 : index
    %17 = vector.load %arg8[%c0_14, %c0_15] : memref<1x32xf32, #tpu.memory_space<vmem>>, vector<1x32xf32>
    %18 = vector.broadcast %17 : vector<1x32xf32> to vector<8x32xf32>
    %19 = arith.addf %16, %18 : vector<8x32xf32>
    %c0_16 = arith.constant 0 : index
    %20 = memref.load %arg9[%c0_16] : memref<1xf32, #tpu.memory_space<smem>>
    %21 = vector.broadcast %20 : f32 to vector<8x32xf32>
    %22 = arith.mulf %21, %14 : vector<8x32xf32>
    %23 = arith.negf %22 : vector<8x32xf32>
    %24 = math.exp %23 : vector<8x32xf32>
    %cst_17 = arith.constant 1.000000e+00 : f32
    %25 = vector.broadcast %cst_17 : f32 to vector<8x32xf32>
    %26 = arith.addf %25, %24 : vector<8x32xf32>
    %27 = arith.divf %25, %26 : vector<8x32xf32>
    %28 = arith.mulf %14, %27 : vector<8x32xf32>
    %29 = arith.mulf %28, %19 : vector<8x32xf32>
    %30 = arith.truncf %29 : vector<8x32xf32> to vector<8x32xbf16>
    %c0_18 = arith.constant 0 : index
    %c0_19 = arith.constant 0 : index
    %c0_20 = arith.constant 0 : index
    %31 = vector.load %arg10[%c0_18, %c0_19, %c0_20] : memref<1x8x32xbf16, #tpu.memory_space<vmem>>, vector<1x8x32xbf16>
    %32 = vector.shape_cast %31 : vector<1x8x32xbf16> to vector<8x32xbf16>
    %33 = vector.shape_cast %30 : vector<8x32xbf16> to vector<1x8x32xbf16>
    tpu.vector_store %arg10[%c0_18, %c0_19, %c0_20], %33 {strides = array<i32>} : memref<1x8x32xbf16, #tpu.memory_space<vmem>>, vector<1x8x32xbf16>,
    return
  }
  func.func @transform_0(%arg0: i32) -> (i32, i32, i32) {
    %c0_i32 = arith.constant 0 : i32
    %c0_i32_0 = arith.constant 0 : i32
    %c0_i32_1 = arith.constant 0 : i32
    return %arg0, %c0_i32, %c0_i32_0 : i32, i32, i32
  }
  func.func @transform_1(%arg0: i32) -> (i32, i32) {
    %c0_i32 = arith.constant 0 : i32
    %c0_i32_0 = arith.constant 0 : i32
    %c0_i32_1 = arith.constant 0 : i32
    return %c0_i32, %c0_i32_0 : i32, i32
  }
  func.func @transform_2(%arg0: i32) -> (i32, i32) {
    %c0_i32 = arith.constant 0 : i32
    %c0_i32_0 = arith.constant 0 : i32
    %c0_i32_1 = arith.constant 0 : i32
    return %c0_i32, %c0_i32_0 : i32, i32
  }
  func.func @transform_3(%arg0: i32) -> (i32, i32) {
    %c0_i32 = arith.constant 0 : i32
    %c0_i32_0 = arith.constant 0 : i32
    %c0_i32_1 = arith.constant 0 : i32
    return %c0_i32, %c0_i32_0 : i32, i32
  }
  func.func @transform_4(%arg0: i32) -> (i32, i32) {
    %c0_i32 = arith.constant 0 : i32
    %c0_i32_0 = arith.constant 0 : i32
    %c0_i32_1 = arith.constant 0 : i32
    return %c0_i32, %c0_i32_0 : i32, i32
  }
  func.func @transform_5(%arg0: i32) -> (i32, i32) {
    %c0_i32 = arith.constant 0 : i32
    %c0_i32_0 = arith.constant 0 : i32
    %c0_i32_1 = arith.constant 0 : i32
    return %c0_i32, %c0_i32_0 : i32, i32
  }
  func.func @transform_6(%arg0: i32) -> (i32, i32) {
    %c0_i32 = arith.constant 0 : i32
    %c0_i32_0 = arith.constant 0 : i32
    %c0_i32_1 = arith.constant 0 : i32
    return %c0_i32, %c0_i32_0 : i32, i32
  }
  func.func @transform_7(%arg0: i32) -> (i32, i32) {
    %c0_i32 = arith.constant 0 : i32
    %c0_i32_0 = arith.constant 0 : i32
    %c0_i32_1 = arith.constant 0 : i32
    return %c0_i32, %c0_i32_0 : i32, i32
  }
  func.func @transform_8(%arg0: i32) -> i32 {
    %c0_i32 = arith.constant 0 : i32
    %c0_i32_0 = arith.constant 0 : i32
    return %c0_i32 : i32
  }
  func.func @transform_9(%arg0: i32) -> (i32, i32, i32) {
    %c0_i32 = arith.constant 0 : i32
    %c0_i32_0 = arith.constant 0 : i32
    %c0_i32_1 = arith.constant 0 : i32
    return %arg0, %c0_i32, %c0_i32_0 : i32, i32, i32
  }
}

module attributes {stable_mosaic.version = 11 : i64} {
  func.func @_ff_swiglu_kernel(%arg0: i32, %arg1: memref<1x8x32xbf16, #tpu.memory_space<vmem>>, %arg2: memref<8x32xf32, #tpu.memory_space<vmem>>, %arg3: memref<32x32xbf16, #tpu.memory_space<vmem>>, %arg4: memref<1x32xf32, #tpu.memory_space<vmem>>, %arg5: memref<32x32xbf16, #tpu.memory_space<vmem>>, %arg6: memref<1x32xf32, #tpu.memory_space<vmem>>, %arg7: memref<32x32xbf16, #tpu.memory_space<vmem>>, %arg8: memref<1x32xf32, #tpu.memory_space<vmem>>, %arg9: memref<1xf32, #tpu.memory_space<smem>>, %arg10: memref<1x8x32xbf16, #tpu.memory_space<vmem>>) attributes {dimension_semantics = [#tpu.dimension_semantics<parallel>], iteration_bounds = array<i64: 2>, scalar_prefetch = 0 : i64, scratch_operands = 0 : i64, tpu.core_type = #tpu.core_type<tc>, window_params = [{transform_indices = @transform_0, window_bounds = array<i64: 1, 8, 32>}, {pipeline_mode = #tpu.pipeline_mode<synchronous>, transform_indices = @transform_1, window_bounds = array<i64: 8, 32>}, {pipeline_mode = #tpu.pipeline_mode<synchronous>, transform_indices = @transform_2, window_bounds = array<i64: 32, 32>}, {pipeline_mode = #tpu.pipeline_mode<synchronous>, transform_indices = @transform_3, window_bounds = array<i64: 1, 32>}, {pipeline_mode = #tpu.pipeline_mode<synchronous>, transform_indices = @transform_4, window_bounds = array<i64: 32, 32>}, {pipeline_mode = #tpu.pipeline_mode<synchronous>, transform_indices = @transform_5, window_bounds = array<i64: 1, 32>}, {pipeline_mode = #tpu.pipeline_mode<synchronous>, transform_indices = @transform_6, window_bounds = array<i64: 32, 32>}, {pipeline_mode = #tpu.pipeline_mode<synchronous>, transform_indices = @transform_7, window_bounds = array<i64: 1, 32>}, {transform_indices = @transform_8, window_bounds = array<i64: 1>}, {transform_indices = @transform_9, window_bounds = array<i64: 1, 8, 32>}]} {
    %c0 = arith.constant 0 : index
    %c0_0 = arith.constant 0 : index
    %c0_1 = arith.constant 0 : index
    %0 = vector.load %arg1[%c0, %c0_0, %c0_1] : memref<1x8x32xbf16, #tpu.memory_space<vmem>>, vector<1x8x32xbf16>
    %1 = vector.shape_cast %0 : vector<1x8x32xbf16> to vector<8x32xbf16>
    %2 = arith.extf %1 : vector<8x32xbf16> to vector<8x32xf32>
    %3 = arith.mulf %2, %2 : vector<8x32xf32>
    %4 = vector.shape_cast %3 : vector<8x32xf32> to vector<1x8x32xf32>
    %cst = arith.constant dense<0.000000e+00> : vector<1xf32>
    %5 = vector.multi_reduction <add>, %4, %cst [1, 2] : vector<1x8x32xf32> to vector<1xf32>
    %6 = vector.shape_cast %5 : vector<1xf32> to vector<1x1x1xf32>
    %7 = vector.extract %6[0, 0, 0] : f32 from vector<1x1x1xf32>
    %cst_2 = arith.constant 2.560000e+02 : f32
    %8 = arith.divf %7, %cst_2 : f32
    %c0_3 = arith.constant 0 : index
    %c0_4 = arith.constant 0 : index
    %9 = vector.load %arg2[%c0_3, %c0_4] : memref<8x32xf32, #tpu.memory_space<vmem>>, vector<8x32xf32>
    %cst_5 = arith.constant 9.99999996E-13 : f32
    %10 = arith.addf %8, %cst_5 : f32
    %11 = math.rsqrt %10 : f32
    %12 = vector.broadcast %11 : f32 to vector<8x32xf32>
    %13 = arith.mulf %2, %12 : vector<8x32xf32>
    %14 = arith.mulf %9, %13 : vector<8x32xf32>
    %15 = arith.truncf %14 : vector<8x32xf32> to vector<8x32xbf16>
    %c0_6 = arith.constant 0 : index
    %c0_7 = arith.constant 0 : index
    %16 = vector.load %arg3[%c0_6, %c0_7] : memref<32x32xbf16, #tpu.memory_space<vmem>>, vector<32x32xbf16>
    %cst_8 = arith.constant dense<0.000000e+00> : vector<8x32xf32>
    %17 = tpu.matmul %15, %16, %cst_8 {dimension_numbers = #tpu.dot_dimension_numbers<[1], [0], [0], [1], [0, 0, 1, 1], [], []>} : vector<8x32xbf16>, vector<32x32xbf16>, vector<8x32xf32> -> vector<8x32xf32>
    %c0_9 = arith.constant 0 : index
    %c0_10 = arith.constant 0 : index
    %18 = vector.load %arg4[%c0_9, %c0_10] : memref<1x32xf32, #tpu.memory_space<vmem>>, vector<1x32xf32>
    %19 = vector.broadcast %18 : vector<1x32xf32> to vector<8x32xf32>
    %20 = arith.addf %17, %19 : vector<8x32xf32>
    %21 = arith.truncf %20 : vector<8x32xf32> to vector<8x32xbf16>
    %c0_11 = arith.constant 0 : index
    %c0_12 = arith.constant 0 : index
    %22 = vector.load %arg5[%c0_11, %c0_12] : memref<32x32xbf16, #tpu.memory_space<vmem>>, vector<32x32xbf16>
    %cst_13 = arith.constant dense<0.000000e+00> : vector<8x32xf32>
    %23 = tpu.matmul %21, %22, %cst_13 {dimension_numbers = #tpu.dot_dimension_numbers<[1], [0], [0], [1], [0, 0, 1, 1], [], []>} : vector<8x32xbf16>, vector<32x32xbf16>, vector<8x32xf32> -> vector<8x32xf32>
    %c0_14 = arith.constant 0 : index
    %c0_15 = arith.constant 0 : index
    %24 = vector.load %arg6[%c0_14, %c0_15] : memref<1x32xf32, #tpu.memory_space<vmem>>, vector<1x32xf32>
    %25 = vector.broadcast %24 : vector<1x32xf32> to vector<8x32xf32>
    %26 = arith.addf %23, %25 : vector<8x32xf32>
    %c0_16 = arith.constant 0 : index
    %c0_17 = arith.constant 0 : index
    %27 = vector.load %arg7[%c0_16, %c0_17] : memref<32x32xbf16, #tpu.memory_space<vmem>>, vector<32x32xbf16>
    %cst_18 = arith.constant dense<0.000000e+00> : vector<8x32xf32>
    %28 = tpu.matmul %21, %27, %cst_18 {dimension_numbers = #tpu.dot_dimension_numbers<[1], [0], [0], [1], [0, 0, 1, 1], [], []>} : vector<8x32xbf16>, vector<32x32xbf16>, vector<8x32xf32> -> vector<8x32xf32>
    %c0_19 = arith.constant 0 : index
    %c0_20 = arith.constant 0 : index
    %29 = vector.load %arg8[%c0_19, %c0_20] : memref<1x32xf32, #tpu.memory_space<vmem>>, vector<1x32xf32>
    %30 = vector.broadcast %29 : vector<1x32xf32> to vector<8x32xf32>
    %31 = arith.addf %28, %30 : vector<8x32xf32>
    %c0_21 = arith.constant 0 : index
    %32 = memref.load %arg9[%c0_21] : memref<1xf32, #tpu.memory_space<smem>>
    %33 = vector.broadcast %32 : f32 to vector<8x32xf32>
    %34 = arith.mulf %33, %26 : vector<8x32xf32>
    %35 = arith.negf %34 : vector<8x32xf32>
    %36 = math.exp %35 : vector<8x32xf32>
    %cst_22 = arith.constant 1.000000e+00 : f32
    %37 = vector.broadcast %cst_22 : f32 to vector<8x32xf32>
    %38 = arith.addf %37, %36 : vector<8x32xf32>
    %39 = arith.divf %37, %38 : vector<8x32xf32>
    %40 = arith.mulf %26, %39 : vector<8x32xf32>
    %41 = arith.mulf %40, %31 : vector<8x32xf32>
    %42 = arith.addf %14, %41 : vector<8x32xf32>
    %43 = arith.truncf %42 : vector<8x32xf32> to vector<8x32xbf16>
    %c0_23 = arith.constant 0 : index
    %c0_24 = arith.constant 0 : index
    %c0_25 = arith.constant 0 : index
    %44 = vector.load %arg10[%c0_23, %c0_24, %c0_25] : memref<1x8x32xbf16, #tpu.memory_space<vmem>>, vector<1x8x32xbf16>
    %45 = vector.shape_cast %44 : vector<1x8x32xbf16> to vector<8x32xbf16>
    %46 = vector.shape_cast %43 : vector<8x32xbf16> to vector<1x8x32xbf16>
    tpu.vector_store %arg10[%c0_23, %c0_24, %c0_25], %46 {strides = array<i32>} : memref<1x8x32xbf16, #tpu.memory_space<vmem>>, vector<1x8x32xbf16>,
    return
  }
  func.func @transform_0(%arg0: i32) -> (i32, i32, i32) {
    %c0_i32 = arith.constant 0 : i32
    %c0_i32_0 = arith.constant 0 : i32
    %c0_i32_1 = arith.constant 0 : i32
    return %arg0, %c0_i32, %c0_i32_0 : i32, i32, i32
  }
  func.func @transform_1(%arg0: i32) -> (i32, i32) {
    %c0_i32 = arith.constant 0 : i32
    %c0_i32_0 = arith.constant 0 : i32
    %c0_i32_1 = arith.constant 0 : i32
    return %c0_i32, %c0_i32_0 : i32, i32
  }
  func.func @transform_2(%arg0: i32) -> (i32, i32) {
    %c0_i32 = arith.constant 0 : i32
    %c0_i32_0 = arith.constant 0 : i32
    %c0_i32_1 = arith.constant 0 : i32
    return %c0_i32, %c0_i32_0 : i32, i32
  }
  func.func @transform_3(%arg0: i32) -> (i32, i32) {
    %c0_i32 = arith.constant 0 : i32
    %c0_i32_0 = arith.constant 0 : i32
    %c0_i32_1 = arith.constant 0 : i32
    return %c0_i32, %c0_i32_0 : i32, i32
  }
  func.func @transform_4(%arg0: i32) -> (i32, i32) {
    %c0_i32 = arith.constant 0 : i32
    %c0_i32_0 = arith.constant 0 : i32
    %c0_i32_1 = arith.constant 0 : i32
    return %c0_i32, %c0_i32_0 : i32, i32
  }
  func.func @transform_5(%arg0: i32) -> (i32, i32) {
    %c0_i32 = arith.constant 0 : i32
    %c0_i32_0 = arith.constant 0 : i32
    %c0_i32_1 = arith.constant 0 : i32
    return %c0_i32, %c0_i32_0 : i32, i32
  }
  func.func @transform_6(%arg0: i32) -> (i32, i32) {
    %c0_i32 = arith.constant 0 : i32
    %c0_i32_0 = arith.constant 0 : i32
    %c0_i32_1 = arith.constant 0 : i32
    return %c0_i32, %c0_i32_0 : i32, i32
  }
  func.func @transform_7(%arg0: i32) -> (i32, i32) {
    %c0_i32 = arith.constant 0 : i32
    %c0_i32_0 = arith.constant 0 : i32
    %c0_i32_1 = arith.constant 0 : i32
    return %c0_i32, %c0_i32_0 : i32, i32
  }
  func.func @transform_8(%arg0: i32) -> i32 {
    %c0_i32 = arith.constant 0 : i32
    %c0_i32_0 = arith.constant 0 : i32
    return %c0_i32 : i32
  }
  func.func @transform_9(%arg0: i32) -> (i32, i32, i32) {
    %c0_i32 = arith.constant 0 : i32
    %c0_i32_0 = arith.constant 0 : i32
    %c0_i32_1 = arith.constant 0 : i32
    return %arg0, %c0_i32, %c0_i32_0 : i32, i32, i32
  }
}

module attributes {stable_mosaic.version = 11 : i64} {
  func.func @_mha_block_kernel(%arg0: i32, %arg1: i32, %arg2: memref<1x8x32xbf16, #tpu.memory_space<vmem>>, %arg3: memref<1x32x96xbf16, #tpu.memory_space<vmem>>, %arg4: memref<1x32x32xbf16, #tpu.memory_space<vmem>>, %arg5: memref<1x32xf32, #tpu.memory_space<vmem>>, %arg6: memref<8x32xf32, #tpu.memory_space<vmem>>, %arg7: memref<8x32xf32, #tpu.memory_space<vmem>>, %arg8: memref<8x32xf32, #tpu.memory_space<vmem>>, %arg9: memref<1x8x32xbf16, #tpu.memory_space<vmem>>, %arg10: memref<8x32xf32, #tpu.memory_space<vmem>>, %arg11: memref<8x32xf32, #tpu.memory_space<vmem>>) attributes {dimension_semantics = [#tpu.dimension_semantics<parallel>, #tpu.dimension_semantics<arbitrary>], iteration_bounds = array<i64: 2, 2>, scalar_prefetch = 0 : i64, scratch_operands = 2 : i64, tpu.core_type = #tpu.core_type<tc>, window_params = [{transform_indices = @transform_0, window_bounds = array<i64: 1, 8, 32>}, {transform_indices = @transform_1, window_bounds = array<i64: 1, 32, 96>}, {transform_indices = @transform_2, window_bounds = array<i64: 1, 32, 32>}, {pipeline_mode = #tpu.pipeline_mode<synchronous>, transform_indices = @transform_3, window_bounds = array<i64: 1, 32>}, {pipeline_mode = #tpu.pipeline_mode<synchronous>, transform_indices = @transform_4, window_bounds = array<i64: 8, 32>}, {pipeline_mode = #tpu.pipeline_mode<synchronous>, transform_indices = @transform_5, window_bounds = array<i64: 8, 32>}, {pipeline_mode = #tpu.pipeline_mode<synchronous>, transform_indices = @transform_6, window_bounds = array<i64: 8, 32>}, {transform_indices = @transform_7, window_bounds = array<i64: 1, 8, 32>}]} {
    %c0_i32 = arith.constant 0 : i32
    %0 = arith.cmpi eq, %arg1, %c0_i32 : i32
    %1 = arith.extui %0 : i1 to i32
    %c0_i32_0 = arith.constant 0 : i32
    %2 = arith.cmpi ne, %1, %c0_i32_0 : i32
    scf.if %2 {
      %c0_24 = arith.constant 0 : index
      %c0_25 = arith.constant 0 : index
      %c0_26 = arith.constant 0 : index
      %57 = vector.load %arg2[%c0_24, %c0_25, %c0_26] : memref<1x8x32xbf16, #tpu.memory_space<vmem>>, vector<1x8x32xbf16>
      %58 = vector.shape_cast %57 : vector<1x8x32xbf16> to vector<8x32xbf16>
      %59 = arith.extf %58 : vector<8x32xbf16> to vector<8x32xf32>
      %60 = arith.mulf %59, %59 : vector<8x32xf32>
      %61 = vector.shape_cast %60 : vector<8x32xf32> to vector<1x8x32xf32>
      %cst_27 = arith.constant dense<0.000000e+00> : vector<1xf32>
      %62 = vector.multi_reduction <add>, %61, %cst_27 [1, 2] : vector<1x8x32xf32> to vector<1xf32>
      %63 = vector.shape_cast %62 : vector<1xf32> to vector<1x1x1xf32>
      %64 = vector.extract %63[0, 0, 0] : f32 from vector<1x1x1xf32>
      %cst_28 = arith.constant 2.560000e+02 : f32
      %65 = arith.divf %64, %cst_28 : f32
      %c0_29 = arith.constant 0 : index
      %c0_30 = arith.constant 0 : index
      %66 = vector.load %arg8[%c0_29, %c0_30] : memref<8x32xf32, #tpu.memory_space<vmem>>, vector<8x32xf32>
      %cst_31 = arith.constant 9.99999996E-13 : f32
      %67 = arith.addf %65, %cst_31 : f32
      %68 = math.rsqrt %67 : f32
      %69 = vector.broadcast %68 : f32 to vector<8x32xf32>
      %70 = arith.mulf %59, %69 : vector<8x32xf32>
      %71 = arith.mulf %66, %70 : vector<8x32xf32>
      %c0_32 = arith.constant 0 : index
      %c0_33 = arith.constant 0 : index
      %72 = vector.load %arg10[%c0_32, %c0_33] : memref<8x32xf32, #tpu.memory_space<vmem>>, vector<8x32xf32>
      tpu.vector_store %arg10[%c0_32, %c0_33], %71 {strides = array<i32>} : memref<8x32xf32, #tpu.memory_space<vmem>>, vector<8x32xf32>,
      %cst_34 = arith.constant 0.000000e+00 : f32
      %73 = vector.broadcast %cst_34 : f32 to vector<8x32xf32>
      %c0_35 = arith.constant 0 : index
      %c0_36 = arith.constant 0 : index
      %74 = vector.load %arg11[%c0_35, %c0_36] : memref<8x32xf32, #tpu.memory_space<vmem>>, vector<8x32xf32>
      tpu.vector_store %arg11[%c0_35, %c0_36], %73 {strides = array<i32>} : memref<8x32xf32, #tpu.memory_space<vmem>>, vector<8x32xf32>,
    } else {
    }
    %c0 = arith.constant 0 : index
    %c0_1 = arith.constant 0 : index
    %3 = vector.load %arg10[%c0, %c0_1] : memref<8x32xf32, #tpu.memory_space<vmem>>, vector<8x32xf32>
    %4 = arith.truncf %3 : vector<8x32xf32> to vector<8x32xbf16>
    %c0_2 = arith.constant 0 : index
    %c0_3 = arith.constant 0 : index
    %c0_4 = arith.constant 0 : index
    %5 = vector.load %arg3[%c0_2, %c0_3, %c0_4] : memref<1x32x96xbf16, #tpu.memory_space<vmem>>, vector<1x32x96xbf16>
    %6 = vector.shape_cast %5 : vector<1x32x96xbf16> to vector<32x96xbf16>
    %cst = arith.constant dense<0.000000e+00> : vector<8x96xf32>
    %7 = tpu.matmul %4, %6, %cst {dimension_numbers = #tpu.dot_dimension_numbers<[1], [0], [0], [1], [0, 0, 1, 1], [], []>} : vector<8x32xbf16>, vector<32x96xbf16>, vector<8x96xf32> -> vector<8x96xf32>
    %8 = vector.extract_strided_slice %7 {offsets = [0, 0], sizes = [8, 32], strides = [1, 1]} : vector<8x96xf32> to vector<8x32xf32>
    %9 = vector.extract_strided_slice %7 {offsets = [0, 32], sizes = [8, 32], strides = [1, 1]} : vector<8x96xf32> to vector<8x32xf32>
    %10 = vector.extract_strided_slice %7 {offsets = [0, 64], sizes = [8, 32], strides = [1, 1]} : vector<8x96xf32> to vector<8x32xf32>
    %c0_5 = arith.constant 0 : index
    %c0_6 = arith.constant 0 : index
    %11 = vector.load %arg6[%c0_5, %c0_6] : memref<8x32xf32, #tpu.memory_space<vmem>>, vector<8x32xf32>
    %c0_7 = arith.constant 0 : index
    %c0_8 = arith.constant 0 : index
    %12 = vector.load %arg7[%c0_7, %c0_8] : memref<8x32xf32, #tpu.memory_space<vmem>>, vector<8x32xf32>
    %13 = vector.extract_strided_slice %8 {offsets = [0, 16], sizes = [8, 16], strides = [1, 1]} : vector<8x32xf32> to vector<8x16xf32>
    %14 = vector.extract_strided_slice %8 {offsets = [0, 0], sizes = [8, 16], strides = [1, 1]} : vector<8x32xf32> to vector<8x16xf32>
    %15 = tpu.concatenate %13, %14 in 1 : vector<8x16xf32>, vector<8x16xf32> -> vector<8x32xf32>
    %16 = arith.mulf %8, %11 : vector<8x32xf32>
    %17 = arith.mulf %15, %12 : vector<8x32xf32>
    %18 = arith.addf %16, %17 : vector<8x32xf32>
    %19 = vector.extract_strided_slice %9 {offsets = [0, 16], sizes = [8, 16], strides = [1, 1]} : vector<8x32xf32> to vector<8x16xf32>
    %20 = vector.extract_strided_slice %9 {offsets = [0, 0], sizes = [8, 16], strides = [1, 1]} : vector<8x32xf32> to vector<8x16xf32>
    %21 = tpu.concatenate %19, %20 in 1 : vector<8x16xf32>, vector<8x16xf32> -> vector<8x32xf32>
    %22 = arith.mulf %9, %11 : vector<8x32xf32>
    %23 = arith.mulf %21, %12 : vector<8x32xf32>
    %24 = arith.addf %22, %23 : vector<8x32xf32>
    %25 = arith.truncf %18 : vector<8x32xf32> to vector<8x32xbf16>
    %26 = arith.truncf %24 : vector<8x32xf32> to vector<8x32xbf16>
    %cst_9 = arith.constant dense<0.000000e+00> : vector<8x8xf32>
    %27 = tpu.matmul %25, %26, %cst_9 {dimension_numbers = #tpu.dot_dimension_numbers<[1], [1], [0], [0], [0, 0, 1, 0], [], []>} : vector<8x32xbf16>, vector<8x32xbf16>, vector<8x8xf32> -> vector<8x8xf32>
    %cst_10 = arith.constant 0.176776692 : f32
    %28 = vector.broadcast %cst_10 : f32 to vector<8x8xf32>
    %29 = arith.mulf %27, %28 : vector<8x8xf32>
    %30 = tpu.iota {dimensions = array<i32: 0>} : vector<8x8xi32>
    %31 = tpu.iota {dimensions = array<i32: 1>} : vector<8x8xi32>
    %32 = arith.cmpi sle, %31, %30 : vector<8x8xi32>
    %cst_11 = arith.constant -1.000000e+30 : f32
    %33 = vector.broadcast %cst_11 : f32 to vector<8x8xf32>
    %34 = arith.select %32, %29, %33 : vector<8x8xi1>, vector<8x8xf32>
    %cst_12 = arith.constant dense<0xFF800000> : vector<8xf32>
    %35 = vector.multi_reduction <maximumf>, %34, %cst_12 [1] : vector<8x8xf32> to vector<8xf32>
    %36 = vector.shape_cast %35 : vector<8xf32> to vector<8x1xf32>
    %37 = vector.broadcast %36 : vector<8x1xf32> to vector<8x8xf32>
    %38 = arith.subf %34, %37 : vector<8x8xf32>
    %39 = math.exp %38 : vector<8x8xf32>
    %cst_13 = arith.constant dense<0.000000e+00> : vector<8xf32>
    %40 = vector.multi_reduction <add>, %39, %cst_13 [1] : vector<8x8xf32> to vector<8xf32>
    %41 = vector.shape_cast %40 : vector<8xf32> to vector<8x1xf32>
    %42 = vector.broadcast %41 : vector<8x1xf32> to vector<8x8xf32>
    %43 = arith.divf %39, %42 : vector<8x8xf32>
    %44 = arith.truncf %43 : vector<8x8xf32> to vector<8x8xbf16>
    %45 = arith.truncf %10 : vector<8x32xf32> to vector<8x32xbf16>
    %cst_14 = arith.constant dense<0.000000e+00> : vector<8x32xf32>
    %46 = tpu.matmul %44, %45, %cst_14 {dimension_numbers = #tpu.dot_dimension_numbers<[1], [0], [0], [1], [0, 0, 1, 1], [], []>} : vector<8x8xbf16>, vector<8x32xbf16>, vector<8x32xf32> -> vector<8x32xf32>
    %c0_15 = arith.constant 0 : index
    %c0_16 = arith.constant 0 : index
    %47 = vector.load %arg11[%c0_15, %c0_16] : memref<8x32xf32, #tpu.memory_space<vmem>>, vector<8x32xf32>
    %48 = arith.truncf %46 : vector<8x32xf32> to vector<8x32xbf16>
    %c0_17 = arith.constant 0 : index
    %c0_18 = arith.constant 0 : index
    %c0_19 = arith.constant 0 : index
    %49 = vector.load %arg4[%c0_17, %c0_18, %c0_19] : memref<1x32x32xbf16, #tpu.memory_space<vmem>>, vector<1x32x32xbf16>
    %50 = vector.shape_cast %49 : vector<1x32x32xbf16> to vector<32x32xbf16>
    %cst_20 = arith.constant dense<0.000000e+00> : vector<8x32xf32>
    %51 = tpu.matmul %48, %50, %cst_20 {dimension_numbers = #tpu.dot_dimension_numbers<[1], [0], [0], [1], [0, 0, 1, 1], [], []>} : vector<8x32xbf16>, vector<32x32xbf16>, vector<8x32xf32> -> vector<8x32xf32>
    %52 = arith.addf %47, %51 : vector<8x32xf32>
    %c0_21 = arith.constant 0 : index
    %c0_22 = arith.constant 0 : index
    %53 = vector.load %arg11[%c0_21, %c0_22] : memref<8x32xf32, #tpu.memory_space<vmem>>, vector<8x32xf32>
    tpu.vector_store %arg11[%c0_21, %c0_22], %52 {strides = array<i32>} : memref<8x32xf32, #tpu.memory_space<vmem>>, vector<8x32xf32>,
    %c1_i32 = arith.constant 1 : i32
    %54 = arith.cmpi eq, %arg1, %c1_i32 : i32
    %55 = arith.extui %54 : i1 to i32
    %c0_i32_23 = arith.constant 0 : i32
    %56 = arith.cmpi ne, %55, %c0_i32_23 : i32
    scf.if %56 {
      %c0_24 = arith.constant 0 : index
      %c0_25 = arith.constant 0 : index
      %57 = vector.load %arg10[%c0_24, %c0_25] : memref<8x32xf32, #tpu.memory_space<vmem>>, vector<8x32xf32>
      %c0_26 = arith.constant 0 : index
      %c0_27 = arith.constant 0 : index
      %58 = vector.load %arg11[%c0_26, %c0_27] : memref<8x32xf32, #tpu.memory_space<vmem>>, vector<8x32xf32>
      %59 = arith.addf %57, %58 : vector<8x32xf32>
      %c0_28 = arith.constant 0 : index
      %c0_29 = arith.constant 0 : index
      %60 = vector.load %arg5[%c0_28, %c0_29] : memref<1x32xf32, #tpu.memory_space<vmem>>, vector<1x32xf32>
      %61 = vector.broadcast %60 : vector<1x32xf32> to vector<8x32xf32>
      %62 = arith.addf %59, %61 : vector<8x32xf32>
      %63 = arith.truncf %62 : vector<8x32xf32> to vector<8x32xbf16>
      %c0_30 = arith.constant 0 : index
      %c0_31 = arith.constant 0 : index
      %c0_32 = arith.constant 0 : index
      %64 = vector.load %arg9[%c0_30, %c0_31, %c0_32] : memref<1x8x32xbf16, #tpu.memory_space<vmem>>, vector<1x8x32xbf16>
      %65 = vector.shape_cast %64 : vector<1x8x32xbf16> to vector<8x32xbf16>
      %66 = vector.shape_cast %63 : vector<8x32xbf16> to vector<1x8x32xbf16>
      tpu.vector_store %arg9[%c0_30, %c0_31, %c0_32], %66 {strides = array<i32>} : memref<1x8x32xbf16, #tpu.memory_space<vmem>>, vector<1x8x32xbf16>,
    } else {
    }
    return
  }
  func.func @transform_0(%arg0: i32, %arg1: i32) -> (i32, i32, i32) {
    %c0_i32 = arith.constant 0 : i32
    %c0_i32_0 = arith.constant 0 : i32
    %c0_i32_1 = arith.constant 0 : i32
    return %arg0, %c0_i32, %c0_i32_0 : i32, i32, i32
  }
  func.func @transform_1(%arg0: i32, %arg1: i32) -> (i32, i32, i32) {
    %c0_i32 = arith.constant 0 : i32
    %c0_i32_0 = arith.constant 0 : i32
    %c0_i32_1 = arith.constant 0 : i32
    return %arg1, %c0_i32, %c0_i32_0 : i32, i32, i32
  }
  func.func @transform_2(%arg0: i32, %arg1: i32) -> (i32, i32, i32) {
    %c0_i32 = arith.constant 0 : i32
    %c0_i32_0 = arith.constant 0 : i32
    %c0_i32_1 = arith.constant 0 : i32
    return %arg1, %c0_i32, %c0_i32_0 : i32, i32, i32
  }
  func.func @transform_3(%arg0: i32, %arg1: i32) -> (i32, i32) {
    %c0_i32 = arith.constant 0 : i32
    %c0_i32_0 = arith.constant 0 : i32
    %c0_i32_1 = arith.constant 0 : i32
    return %c0_i32, %c0_i32_0 : i32, i32
  }
  func.func @transform_4(%arg0: i32, %arg1: i32) -> (i32, i32) {
    %c0_i32 = arith.constant 0 : i32
    %c0_i32_0 = arith.constant 0 : i32
    %c0_i32_1 = arith.constant 0 : i32
    return %c0_i32, %c0_i32_0 : i32, i32
  }
  func.func @transform_5(%arg0: i32, %arg1: i32) -> (i32, i32) {
    %c0_i32 = arith.constant 0 : i32
    %c0_i32_0 = arith.constant 0 : i32
    %c0_i32_1 = arith.constant 0 : i32
    return %c0_i32, %c0_i32_0 : i32, i32
  }
  func.func @transform_6(%arg0: i32, %arg1: i32) -> (i32, i32) {
    %c0_i32 = arith.constant 0 : i32
    %c0_i32_0 = arith.constant 0 : i32
    %c0_i32_1 = arith.constant 0 : i32
    return %c0_i32, %c0_i32_0 : i32, i32
  }
  func.func @transform_7(%arg0: i32, %arg1: i32) -> (i32, i32, i32) {
    %c0_i32 = arith.constant 0 : i32
    %c0_i32_0 = arith.constant 0 : i32
    %c0_i32_1 = arith.constant 0 : i32
    return %arg0, %c0_i32, %c0_i32_0 : i32, i32, i32
  }
}

module attributes {stable_mosaic.version = 11 : i64} {
  func.func @_linear_kernel(%arg0: i32, %arg1: i32, %arg2: i32, %arg3: memref<8x32xbf16, #tpu.memory_space<vmem>>, %arg4: memref<32x64xbf16, #tpu.memory_space<vmem>>, %arg5: memref<1x64xf32, #tpu.memory_space<vmem>>, %arg6: memref<8x64xf32, #tpu.memory_space<vmem>>, %arg7: memref<8x64xf32, #tpu.memory_space<vmem>>) attributes {dimension_semantics = [#tpu.dimension_semantics<parallel>, #tpu.dimension_semantics<parallel>, #tpu.dimension_semantics<arbitrary>], iteration_bounds = array<i64: 2, 1, 1>, scalar_prefetch = 0 : i64, scratch_operands = 1 : i64, tpu.core_type = #tpu.core_type<tc>, window_params = [{transform_indices = @transform_0, window_bounds = array<i64: 8, 32>}, {transform_indices = @transform_1, window_bounds = array<i64: 32, 64>}, {transform_indices = @transform_2, window_bounds = array<i64: 1, 64>}, {transform_indices = @transform_3, window_bounds = array<i64: 8, 64>}]} {
    %c0_i32 = arith.constant 0 : i32
    %0 = arith.cmpi eq, %arg2, %c0_i32 : i32
    %1 = arith.extui %0 : i1 to i32
    %c0_i32_0 = arith.constant 0 : i32
    %2 = arith.cmpi ne, %1, %c0_i32_0 : i32
    scf.if %2 {
      %cst_10 = arith.constant 0.000000e+00 : f32
      %12 = vector.broadcast %cst_10 : f32 to vector<8x64xf32>
      %c0_11 = arith.constant 0 : index
      %c0_12 = arith.constant 0 : index
      %13 = vector.load %arg7[%c0_11, %c0_12] : memref<8x64xf32, #tpu.memory_space<vmem>>, vector<8x64xf32>
      tpu.vector_store %arg7[%c0_11, %c0_12], %12 {strides = array<i32>} : memref<8x64xf32, #tpu.memory_space<vmem>>, vector<8x64xf32>,
    } else {
    }
    %c0 = arith.constant 0 : index
    %c0_1 = arith.constant 0 : index
    %3 = vector.load %arg7[%c0, %c0_1] : memref<8x64xf32, #tpu.memory_space<vmem>>, vector<8x64xf32>
    %c0_2 = arith.constant 0 : index
    %c0_3 = arith.constant 0 : index
    %4 = vector.load %arg3[%c0_2, %c0_3] : memref<8x32xbf16, #tpu.memory_space<vmem>>, vector<8x32xbf16>
    %c0_4 = arith.constant 0 : index
    %c0_5 = arith.constant 0 : index
    %5 = vector.load %arg4[%c0_4, %c0_5] : memref<32x64xbf16, #tpu.memory_space<vmem>>, vector<32x64xbf16>
    %cst = arith.constant dense<0.000000e+00> : vector<8x64xf32>
    %6 = tpu.matmul %4, %5, %cst {dimension_numbers = #tpu.dot_dimension_numbers<[1], [0], [0], [1], [0, 0, 1, 1], [], []>} : vector<8x32xbf16>, vector<32x64xbf16>, vector<8x64xf32> -> vector<8x64xf32>
    %7 = arith.addf %3, %6 : vector<8x64xf32>
    %c0_6 = arith.constant 0 : index
    %c0_7 = arith.constant 0 : index
    %8 = vector.load %arg7[%c0_6, %c0_7] : memref<8x64xf32, #tpu.memory_space<vmem>>, vector<8x64xf32>
    tpu.vector_store %arg7[%c0_6, %c0_7], %7 {strides = array<i32>} : memref<8x64xf32, #tpu.memory_space<vmem>>, vector<8x64xf32>,
    %c0_i32_8 = arith.constant 0 : i32
    %9 = arith.cmpi eq, %arg2, %c0_i32_8 : i32
    %10 = arith.extui %9 : i1 to i32
    %c0_i32_9 = arith.constant 0 : i32
    %11 = arith.cmpi ne, %10, %c0_i32_9 : i32
    scf.if %11 {
      %c0_10 = arith.constant 0 : index
      %c0_11 = arith.constant 0 : index
      %12 = vector.load %arg7[%c0_10, %c0_11] : memref<8x64xf32, #tpu.memory_space<vmem>>, vector<8x64xf32>
      %c0_12 = arith.constant 0 : index
      %c0_13 = arith.constant 0 : index
      %13 = vector.load %arg5[%c0_12, %c0_13] : memref<1x64xf32, #tpu.memory_space<vmem>>, vector<1x64xf32>
      %14 = vector.broadcast %13 : vector<1x64xf32> to vector<8x64xf32>
      %15 = arith.addf %12, %14 : vector<8x64xf32>
      %c0_14 = arith.constant 0 : index
      %c0_15 = arith.constant 0 : index
      %16 = vector.load %arg6[%c0_14, %c0_15] : memref<8x64xf32, #tpu.memory_space<vmem>>, vector<8x64xf32>
      tpu.vector_store %arg6[%c0_14, %c0_15], %15 {strides = array<i32>} : memref<8x64xf32, #tpu.memory_space<vmem>>, vector<8x64xf32>,
    } else {
    }
    return
  }
  func.func @transform_0(%arg0: i32, %arg1: i32, %arg2: i32) -> (i32, i32) {
    %c0_i32 = arith.constant 0 : i32
    return %arg0, %arg2 : i32, i32
  }
  func.func @transform_1(%arg0: i32, %arg1: i32, %arg2: i32) -> (i32, i32) {
    %c0_i32 = arith.constant 0 : i32
    return %arg2, %arg1 : i32, i32
  }
  func.func @transform_2(%arg0: i32, %arg1: i32, %arg2: i32) -> (i32, i32) {
    %c0_i32 = arith.constant 0 : i32
    %c0_i32_0 = arith.constant 0 : i32
    return %c0_i32, %arg1 : i32, i32
  }
  func.func @transform_3(%arg0: i32, %arg1: i32, %arg2: i32) -> (i32, i32) {
    %c0_i32 = arith.constant 0 : i32
    return %arg0, %arg1 : i32, i32
  }
}

</mosaic_0001>

<bundles_post_ra>
// kernel: llama_forward.11
= control target key start
LH: loop header
LB: loop body
LE: loop exit
PB: predicated region body
PF: predicated region fallthrough
CT: control target
= control target key end

     0   :  { %8 = vsyncpa [#allocation4], 0  ;;  %s748_s0 = inlined_call_operand.vmem [shape: bf16[16,32], index: 0, kind: input, shape index: {}]   ;;  %s749_s1 = inlined_call_operand.vmem [shape: bf16[32,64], index: 1, kind: input, shape index: {}]   ;;  %s750_s2 = inlined_call_operand.vmem [shape: f32[1,64], index: 2, kind: input, shape index: {}]   ;;  %s751_s3 = inlined_call_operand.hbm [shape: f32[16,64], index: 3, kind: output, shape index: {}]  }
   0x1   :  { %10 = vsyncpa [#allocation4 + $0x1], 0  ;;  %s637_s12 = smov 0   ;;  %s639_s13 = smov 0  }
   0x2   :  { %s641_s14 = smov 0   ;;  %s643_s15 = smov 0  }
   0x3   :  { %s645_s16 = smov 0   ;;  %s647_s17 = smov 0  }
   0x4 LB: > { %s449_s18 = sadd.s32 4294967295, %s612_s17   ;;  %s450_s19 = sadd.s32 4294967294, %s612_s17   ;;  %s612_s17 = sphi %s647_s17, %s16_s17   ;;  %s608_s16 = sphi %s645_s16, %s758_s16   ;;  %s604_s15 = sphi %s643_s15, %s757_s15   ;;  %s600_s14 = sphi %s641_s14, %s756_s14   ;;  %s596_s13 = sphi %s639_s13, %s755_s13   ;;  %s592_s12 = sphi %s637_s12, %s754_s12  }
   0x5   : > { %s35_s20 = sadd.s32 1, %s608_s16  ;;  %s126_s21 = sadd.s32 1, %s600_s14 }
   0x6   : > { %p37_p0 = scmp.ge.s32.totalorder %s35_s20, 2  ;;  %p136_p1 = scmp.ne.s32.totalorder %s600_s14, %s596_s13 }
   0x7   : > { %p137_p2 = scmp.eq.s32.totalorder %s449_s18, 1  ;;  %p142_p3 = scmp.ne.s32.totalorder %s596_s13, %s592_s12 }
   0x8   : > { %s760_s20 = smov (%p37_p0, %s35_s20), 0  ;;  %p143_p5 = scmp.eq.s32.totalorder %s450_s19, 1 }
   0x9   : > { %p677_p4 = por %p137_p2, %p136_p1  ;;  %s121_s23 = ssub.s32 %s608_s16, %s760_s20 }
   0xa   : > { %p455_p6 = scmp.ge.s32.totalorder %s612_s17, 1  ;;  %p124_p7 = scmp.eq.s32.totalorder %s121_s23, 0 }
   0xb   : > { %p684_p8 = por %p143_p5, %p142_p3  ;;  %p189_p9 = scmp.lt.s32.totalorder %s612_s17, 3 }
   0xc   : > { %s690_s25 = scalar_select %p124_p7, %s600_s14, %s126_s21  }
   0xd   : > { %p190_p10 = pnand %p455_p6, %p189_p9 }
   0xe   : > { %p226_p11 = scmp.lt.s32.totalorder (!%p190_p10), %s604_s15, 1  ;;  %s223_s8 = sand.u32 (!%p190_p10), 1, %s596_s13  }
   0xf   : > { %193 = sbr.rel (%p190_p10) target bundleno = 247 (0xf7), region = 32  ;;  %s456_s9 = sshll.u32 (!%p190_p10), %s223_s8, 3 }
  0x10   : > { %s463_s18 = sshll.u32 (!%p190_p10), %s604_s15, 7  ;;  %s225_s19 = scalar_lea.vmem (!%p190_p10), [#allocation3], %s456_s9 }
  0x11   : > { %s345_s21 = sshll.u32 (!%p190_p10), %s225_s19, 4  ;;  %s343_s27 = scalar_lea.hbm (!%p190_p10), %s751_s3, %s463_s18  ;;  %s346_s21 = int_to_ptr.vmem [resolvable:$true] %s345_s21 }
  0x12   : > { %s331_s28 = scalar_lea.sflag (!%p190_p10), [#allocation4], %s223_s8  ;;  %s536_s29 = scalar_lea.vmem (!%p190_p10), %s346_s21, 128 }
  0x13   : > { %p537_p12 = scmp.ne.s32.totalorder (!%p190_p10), %s346_s21, %s536_s29 }
  0x14   : > { %v534_v0 = vld [vmem:[%s749_s1 + $0x8] sm:$0xff]   ;;  %v614_v1 = vmov 0.0   ;;  %v535_v2 = vld [vmem:[%s749_s1] sm:$0xff]   ;;  %vm615_vm0 = vmmov 0   ;;  %vm250_vm1 = vcmask 523264   ;;  %s227_s30 = scalar_select %p226_p11, %s604_s15, 1 }
  0x15   : > { %469 = vmatprep.subr.bf16.mxu0 %v614_v1  ;;  %473 = vmatprep.mubr.msk.bf16.mxu0 %vm615_vm0, %v614_v1  ;;  %251 = vst.msk [vmem:[#allocation2] sm:$0xff] %vm250_vm1, %v614_v1  ;;  %vm270_vm2 = vcmask 261120   ;;  %v461_v10 = vld [vmem:[%s750_s2] ss:$0 sm:$0xff]  ;;  %p538_p13 = pnand %p537_p12, %p677_p4 }
  0x16   : > { %470 = vmatpush3.bf16.msra.mxu0 %v534_v0  ;;  %s457_s4 = sshll.u32 %s227_s30, 2  ;;  %s616_s30 = smov [#allocation3]  }
  0x17   : > { %471 = vmatprep.subr.bf16.mxu0 %v614_v1  ;;  %s232_s7 = scalar_lea.vmem %s748_s0, %s457_s4  ;;  %p539_p0 = pneg %p538_p13 }
  0x18   : > { %v253_v3 = vld [vmem:[%s232_s7] sm:$0xf]  ;;  %s540_s4 = sshll.u32 %s616_s30, 4  ;;  %s541_s4 = int_to_ptr.vmem [resolvable:$false] %s540_s4 }
  0x19   : > { %s542_s15 = scalar_lea.vmem %s541_s4, 256  ;;  %p543_p1 = scmp.lt.s32.totalorder %s346_s21, %s541_s4 }
  0x1a   : > { %472 = vmatpush3.bf16.msra.mxu0 %v535_v2  ;;  %p544_p2 = scmp.lt.s32.totalorder %s542_s15, %s536_s29 }
  0x1c   : > { %v252_v4 = vld [vmem:[#allocation2] sm:$0xff]  ;;  %p545_p3 = por %p544_p2, %p543_p1 }
  0x1d   : > { %474 = vmatmul.mubr.msk.bf16.vlgmr.msra.gmra.mxu0 %vm270_vm2, %v253_v3 }
  0x1e   : > { %p546_p5 = pnand %p545_p3, %p539_p0 }
  0xdd   : > { %v308_v5 = vpop.f32.mrf.mxu0 }
  0xde   : > { %v314_v6 = vadd.f32 %v308_v5, %v252_v4 }
  0xdf   : > { %v475_v7 = vpop.f32.mrf.mxu0 }
  0xe0   : > { %316 = vst.msk [vmem:[#allocation2] sm:$0xff] %vm250_vm1, %v314_v6 }
  0xe1   : > { %v311_v8 = vpop.f32.mrf.mxu0 }
  0xe3   : > { %v476_v9 = vpop.f32.mrf.mxu0 }
  0xe7   : > { %v320_v11 = vld [vmem:[#allocation2] sm:$0xff] }
  0xe8   : > { %v328_v12 = vadd.f32 %v461_v10, %v320_v11 }
  0xea   : > { %329 = vst.msk [vmem:[%s225_s19] sm:$0xff] %vm250_vm1, %v328_v12 }
  0xeb   : > { %549 = shalt.err (!%p546_p5)
}
  0xec   : > { %s550_s5 = scalar_lea.hbm %s343_s27, 128  ;;  %s554_s8 = scalar_lea.hbm %s751_s3, 256 }
  0xed   : > { %p551_p6 = scmp.ne.s32.totalorder %s343_s27, %s550_s5  ;;  %p555_p10 = scmp.lt.s32.totalorder %s343_s27, %s751_s3 }
  0xee   : > { %p556_p11 = scmp.lt.s32.totalorder %s554_s8, %s550_s5 }
  0xef   : > { %p552_p7 = pnand %p551_p6, %p677_p4 }
  0xf0   : > { %p557_p12 = por %p556_p11, %p555_p10 }
  0xf1   : > { %p553_p9 = pneg %p552_p7 }
  0xf3   : > { %p558_p13 = pnand %p557_p12, %p553_p9 }
  0xf5   : > { %561 = shalt.err (!%p558_p13)
}
  0xf6   : > { %477 = dma.vmem_to_hbm [thread:$0]  (%p677_p4), %s346_s21, 128, %s343_s27, %s331_s28  }
  0xf7 PF: > { %p483_p0 = scmp.ge.s32.totalorder %s612_s17, 2  ;;  %s357_s11 = sand.u32 1, %s592_s12  }
  0xf8   : > { %s358_s18 = scalar_lea.sflag [#allocation4], %s357_s11 }
  0xf9   : > { %p480_p1 = pnand %p483_p0, %p684_p8 }
  0xfb   : > { %p481_p2 = pneg %p480_p1 }
  0xfd   : > { %587 = dma.done.wait (%p481_p2), %s358_s18, 128  }
  0xfe   : > { %589 = vsyncadd (%p481_p2), %s358_s18, 4294967168  ;;  %s16_s17 = sadd.s32 1, %s612_s17   ;;  %s754_s12 = smov %s596_s13 }
  0xff   : > { %p13_p3 = scmp.ge.s32.totalorder %s16_s17, 4   ;;  %s755_s13 = smov %s600_s14 }
 0x100   : > { %s756_s14 = smov %s690_s25  ;;  %s757_s15 = smov %s608_s16 }
 0x101   : > { %s758_s16 = smov %s760_s20  ;;  %15 = sbr.rel (!%p13_p3) target bundleno = 4 (0x4), region = 81 }
 0x106   :  { %363 = vsyncpa [#allocation4], 1 }
 0x107   :  { %365 = vsyncpa [#allocation4 + $0x1], 1 }

// kernel: llama_forward.7
= control target key start
LH: loop header
LB: loop body
LE: loop exit
PB: predicated region body
PF: predicated region fallthrough
CT: control target
= control target key end

     0   :  { %s764_s11 = smov 0   ;;  %s825_s0 = inlined_call_operand.vmem [shape: bf16[2,8,32], index: 0, kind: input, shape index: {}]   ;;  %s826_s1 = inlined_call_operand.vmem [shape: f32[8,32], index: 1, kind: input, shape index: {}]   ;;  %s827_s2 = inlined_call_operand.vmem [shape: bf16[32,32], index: 2, kind: input, shape index: {}]   ;;  %s828_s3 = inlined_call_operand.vmem [shape: f32[1,32], index: 3, kind: input, shape index: {}]   ;;  %s829_s4 = inlined_call_operand.vmem [shape: bf16[32,32], index: 4, kind: input, shape index: {}]   ;;  %s830_s5 = inlined_call_operand.vmem [shape: f32[1,32], index: 5, kind: input, shape index: {}]   ;;  %s831_s6 = inlined_call_operand.vmem [shape: bf16[32,32], index: 6, kind: input, shape index: {}]   ;;  %s832_s7 = inlined_call_operand.vmem [shape: f32[1,32], index: 7, kind: input, shape index: {}]   ;;  %s833_s8 = inlined_call_operand.<no memory space> [shape: f32[1], index: 8, kind: input, shape index: {}]   ;;  %s834_s9 = inlined_call_operand.vmem [shape: bf16[2,8,32], index: 9, kind: output, shape index: {}]  }
   0x1   :  { %14 = sst [smem:[#allocation2]] %s833_s8 }
   0x2 LB: > { %s620_s12 = sadd.s32 4294967295, %s707_s11   ;;  %p624_p0 = scmp.ge.s32.totalorder %s707_s11, 1  ;;  %s707_s11 = sphi %s764_s11, %s20_s11  }
   0x3   : > { %p287_p1 = scmp.lt.s32.totalorder %s707_s11, 3 }
   0x5   : > { %p288_p2 = pnand %p624_p0, %p287_p1 }
   0x6   : > { %p321_p3 = scmp.lt.s32.totalorder (!%p288_p2), %s620_s12, 1  ;;  %s552_s17 = sld [smem:[#allocation2]] (!%p288_p2) }
   0x7   : > { %291 = sbr.rel (%p288_p2) target bundleno = 732 (0x2dc), region = 56 }
   0xc   : > { %s836_s12 = smov (!%p321_p3, %s620_s12), 1  ;;  %vm333_vm0 = vcmask 261120   ;;  %v689_v6 = vld [vmem:[%s827_s2 + $0x8] sm:$0xff]   ;;  %v709_v8 = vmov 0.0   ;;  %v690_v10 = vld [vmem:[%s827_s2] sm:$0xff]   ;;  %vm710_vm1 = vmmov 0   ;;  %v553_v34 = vstv %s552_s17 }
   0xd   : > { %s625_s8 = sshll.u32 %s836_s12, 2  ;;  %651 = vmatprep.subr.bf16.mxu0 %v709_v8  ;;  %659 = vmatprep.subr.bf16.mxu1 %v709_v8  ;;  %v691_v14 = vld [vmem:[%s829_s4 + $0x8] sm:$0xff]   ;;  %v347_v17 = vld [vmem:[%s826_s1] sm:$0xff]  ;;  %vm565_vm2 = vcmask 257024  }
   0xe   : > { %s324_s15 = scalar_lea.vmem %s825_s0, %s625_s8  ;;  %652 = vmatpush3.bf16.msra.mxu0 %v689_v6  ;;  %655 = vmatprep.mubr.msk.bf16.mxu0 %vm710_vm1, %v709_v8  ;;  %v692_v21 = vld [vmem:[%s831_s6 + $0x8] sm:$0xff]   ;;  %v693_v23 = vld [vmem:[%s829_s4] sm:$0xff]  }
   0xf   : > { %v330_v0 = vld [vmem:[%s324_s15] sm:$0xf]  ;;  %653 = vmatprep.subr.bf16.mxu0 %v709_v8  ;;  %663 = vmatprep.mubr.msk.bf16.mxu1 %vm710_vm1, %v709_v8 }
  0x10   : > { %v331_v1 = vunpack.c.l.bf16 %v330_v0  ;;  %660 = vmatpush3.bf16.msra.mxu1 %v691_v14  ;;  %v694_v24 = vld [vmem:[%s831_s6] sm:$0xff]  }
  0x11   : > { %661 = vmatprep.subr.bf16.mxu1 %v709_v8  ;;  %v627_v25 = vld [vmem:[%s828_s3] ss:$0 sm:$0xff] }
  0x12   : > { %v332_v2 = vmul.f32 %v331_v1, %v331_v1  ;;  %654 = vmatpush3.bf16.msra.mxu0 %v690_v10  ;;  %v631_v32 = vld [vmem:[%s830_s5] ss:$0 sm:$0xff] }
  0x13   : > { %667 = vmatprep.subr.bf16.mxu0 %v709_v8  ;;  %v635_v47 = vld [vmem:[%s832_s7] ss:$0 sm:$0xff] }
  0x14   : > { %v334_v3 = vsel %vm333_vm0, %v332_v2, 0.0  ;;  %662 = vmatpush3.bf16.msra.mxu1 %v693_v23 }
  0x15   : > { %335 = vadd.xlane.f32.xlu0 %v334_v3 }
  0x9e   : > { %v336_v4 = vpop.xlane.xlu0 %335 }
  0x9f   : > { %v337_v5 = vrot.slane %v336_v4, 4 }
  0xa1   : > { %v338_v7 = vadd.f32 %v337_v5, %v336_v4 }
  0xa3   : > { %v339_v9 = vrot.slane %v338_v7, 2 }
  0xa5   : > { %v340_v11 = vadd.f32 %v339_v9, %v338_v7 }
  0xa7   : > { %v341_v12 = vrot.slane %v340_v11, 1 }
  0xa9   : > { %v342_v13 = vadd.f32 %v341_v12, %v340_v11 }
  0xab   : > { %675 = vpush %v342_v13 }
  0xdc   : > { %s676_s22 = spop %675 }
  0xdd   : > { %s346_s23 = smul.f32 0.00390625, %s676_s22 }
  0xdf   : > { %s348_s24 = sadd.f32 1e-12, %s346_s23 }
  0xe1   : > { %v349_v15 = vstv %s348_s24  ;;  %s328_s24 = scalar_lea.vmem %s834_s9, %s625_s8 }
  0xe2   : > { %695 = vrsqrt.f32 %v349_v15 }
  0xef   : > { %v696_v16 = vpop.eup %695 }
  0xf0   : > { %677 = vpush %v696_v16 }
 0x121   : > { %s678_s25 = spop %677 }
 0x122   : > { %v352_v18 = vstv %s678_s25 }
 0x123   : > { %v353_v19 = vmul.f32 %v352_v18, %v331_v1 }
 0x125   : > { %v354_v20 = vmul.f32 %v353_v19, %v347_v17 }
 0x127   : > { %v355_v22 = vpack.c.bf16 %v354_v20, %v354_v20 }
 0x129   : > { %656 = vmatmul.mubr.msk.bf16.vlgmr.msra.gmra.mxu0 %vm333_vm0, %v355_v22 }
 0x12a   : > { %668 = vmatpush3.bf16.msra.mxu0 %v692_v21  ;;  %671 = vmatprep.mubr.msk.bf16.mxu0 %vm710_vm1, %v709_v8 }
 0x12b   : > { %669 = vmatprep.subr.bf16.mxu0 %v709_v8 }
 0x12e   : > { %670 = vmatpush3.bf16.msra.mxu0 %v694_v24 }
 0x1e9   : > { %v416_v26 = vpop.f32.mrf.mxu0 }
 0x1ea   : > { %v417_v27 = vadd.f32 %v627_v25, %v416_v26 }
 0x1eb   : > { %v657_v28 = vpop.f32.mrf.mxu0 }
 0x1ec   : > { %v422_v29 = vpack.c.bf16 %v417_v27, %v417_v27 }
 0x1ed   : > { %v419_v30 = vpop.f32.mrf.mxu0 }
 0x1ee   : > { %664 = vmatmul.mubr.msk.bf16.vlgmr.msra.gmra.mxu1 %vm333_vm0, %v422_v29  ;;  %672 = vmatmul.mubr.msk.bf16.vlgmr.msra.gmra.mxu0 %vm333_vm0, %v422_v29 }
 0x1ef   : > { %v658_v31 = vpop.f32.mrf.mxu0 }
 0x2ae   : > { %v483_v33 = vpop.f32.mrf.mxu1  ;;  %v546_v35 = vpop.f32.mrf.mxu0 }
 0x2af   : > { %v484_v36 = vadd.f32 %v631_v32, %v483_v33  ;;  %v547_v50 = vadd.f32 %v635_v47, %v546_v35 }
 0x2b0   : > { %v665_v37 = vpop.f32.mrf.mxu1  ;;  %v673_v38 = vpop.f32.mrf.mxu0 }
 0x2b1   : > { %v554_v39 = vmul.f32 %v553_v34, %v484_v36 }
 0x2b2   : > { %v486_v40 = vpop.f32.mrf.mxu1  ;;  %v549_v41 = vpop.f32.mrf.mxu0 }
 0x2b3   : > { %v639_v42 = vmul.f32 -1.442695, %v554_v39 }
 0x2b4   : > { %v666_v43 = vpop.f32.mrf.mxu1  ;;  %v674_v44 = vpop.f32.mrf.mxu0 }
 0x2b5   : > { %697 = vpow2.f32 %v639_v42 }
 0x2c2   : > { %v698_v45 = vpop.eup %697 }
 0x2c3   : > { %v558_v46 = vadd.f32 1.0, %v698_v45 }
 0x2c5   : > { %699 = vrcp.f32 %v558_v46 }
 0x2d2   : > { %v700_v48 = vpop.eup %699 }
 0x2d3   : > { %v561_v49 = vmul.f32 %v700_v48, %v484_v36 }
 0x2d5   : > { %v562_v51 = vmul.f32 %v561_v49, %v547_v50 }
 0x2d7   : > { %v563_v52 = vadd.f32 %v562_v51, %v354_v20 }
 0x2d9   : > { %v564_v53 = vpack.c.bf16 %v563_v52, %v563_v52 }
 0x2db   : > { %566 = vst.msk [vmem:[%s328_s24] sm:$0xf] %vm565_vm2, %v564_v53 }
 0x2dc PF: > { %s20_s11 = sadd.s32 1, %s707_s11  }
 0x2dd   : > { %p17_p4 = scmp.ge.s32.totalorder %s20_s11, 4  }
 0x2df   :  { %19 = sbr.rel (!%p17_p4) target bundleno = 2 (0x2), region = 86 }

// kernel: llama_forward.10
= control target key start
LH: loop header
LB: loop body
LE: loop exit
PB: predicated region body
PF: predicated region fallthrough
CT: control target
= control target key end

     0   :  { %s735_s10 = smov 0   ;;  %s792_s0 = inlined_call_operand.vmem [shape: bf16[2,8,32], index: 0, kind: input, shape index: {}]   ;;  %s793_s1 = inlined_call_operand.<no memory space> [shape: f32[1,1], index: 1, kind: input, shape index: {}]   ;;  %s794_s2 = inlined_call_operand.vmem [shape: bf16[32,32], index: 2, kind: input, shape index: {}]   ;;  %s795_s3 = inlined_call_operand.vmem [shape: f32[1,32], index: 3, kind: input, shape index: {}]   ;;  %s796_s4 = inlined_call_operand.vmem [shape: bf16[32,32], index: 4, kind: input, shape index: {}]   ;;  %s797_s5 = inlined_call_operand.vmem [shape: f32[1,32], index: 5, kind: input, shape index: {}]   ;;  %s798_s6 = inlined_call_operand.vmem [shape: bf16[32,32], index: 6, kind: input, shape index: {}]   ;;  %s799_s7 = inlined_call_operand.vmem [shape: f32[1,32], index: 7, kind: input, shape index: {}]   ;;  %s800_s8 = inlined_call_operand.<no memory space> [shape: f32[1], index: 8, kind: input, shape index: {}]   ;;  %s801_s9 = inlined_call_operand.vmem [shape: bf16[2,8,32], index: 9, kind: output, shape index: {}]  }
   0x1   :  { %16 = sst [smem:[#allocation3]] %s800_s8 }
   0x2 LB: > { %s597_s11 = sadd.s32 4294967295, %s678_s10   ;;  %p601_p0 = scmp.ge.s32.totalorder %s678_s10, 1  ;;  %s678_s10 = sphi %s735_s10, %s22_s10  }
   0x3   : > { %p289_p1 = scmp.lt.s32.totalorder %s678_s10, 3 }
   0x5   : > { %p290_p2 = pnand %p601_p0, %p289_p1 }
   0x6   : > { %p323_p3 = scmp.lt.s32.totalorder (!%p290_p2), %s597_s11, 1  ;;  %s530_s28 = sld [smem:[#allocation3]] (!%p290_p2) }
   0x7   : > { %293 = sbr.rel (%p290_p2) target bundleno = 454 (0x1c6), region = 56 }
   0xc   : > { %v662_v0 = vld [vmem:[%s794_s2 + $0x8] sm:$0xff]   ;;  %v680_v1 = vmov 0.0   ;;  %v663_v2 = vld [vmem:[%s794_s2] sm:$0xff]   ;;  %vm681_vm0 = vmmov 0   ;;  %s803_s11 = smov (!%p323_p3, %s597_s11), 1  ;;  %vm356_vm1 = vcmask 261120   ;;  %v531_v17 = vstv %s530_s28 }
   0xd   : > { %628 = vmatprep.subr.bf16.mxu0 %v680_v1  ;;  %636 = vmatprep.subr.bf16.mxu1 %v680_v1  ;;  %v664_v3 = vld [vmem:[%s796_s4 + $0x8] sm:$0xff]   ;;  %s602_s17 = sshll.u32 %s803_s11, 2  ;;  %v666_v6 = vld [vmem:[%s796_s4] sm:$0xff]   ;;  %vm542_vm2 = vcmask 257024  }
   0xe   : > { %629 = vmatpush3.bf16.msra.mxu0 %v662_v0  ;;  %632 = vmatprep.mubr.msk.bf16.mxu0 %vm681_vm0, %v680_v1  ;;  %v665_v4 = vld [vmem:[%s798_s6 + $0x8] sm:$0xff]   ;;  %s326_s22 = scalar_lea.vmem %s792_s0, %s602_s17  ;;  %v667_v7 = vld [vmem:[%s798_s6] sm:$0xff]   ;;  %s330_s15 = scalar_lea.vmem %s801_s9, %s602_s17 }
   0xf   : > { %630 = vmatprep.subr.bf16.mxu0 %v680_v1  ;;  %640 = vmatprep.mubr.msk.bf16.mxu1 %vm681_vm0, %v680_v1  ;;  %v332_v5 = vld [vmem:[%s326_s22] sm:$0xf] }
  0x10   : > { %637 = vmatpush3.bf16.msra.mxu1 %v664_v3  ;;  %v604_v8 = vld [vmem:[%s795_s3] ss:$0 sm:$0xff] }
  0x11   : > { %638 = vmatprep.subr.bf16.mxu1 %v680_v1  ;;  %v608_v15 = vld [vmem:[%s797_s5] ss:$0 sm:$0xff] }
  0x12   : > { %631 = vmatpush3.bf16.msra.mxu0 %v663_v2  ;;  %v612_v30 = vld [vmem:[%s799_s7] ss:$0 sm:$0xff] }
  0x13   : > { %644 = vmatprep.subr.bf16.mxu0 %v680_v1 }
  0x14   : > { %639 = vmatpush3.bf16.msra.mxu1 %v666_v6 }
  0x15   : > { %633 = vmatmul.mubr.msk.bf16.vlgmr.msra.gmra.mxu0 %vm356_vm1, %v332_v5 }
  0x16   : > { %645 = vmatpush3.bf16.msra.mxu0 %v665_v4  ;;  %648 = vmatprep.mubr.msk.bf16.mxu0 %vm681_vm0, %v680_v1 }
  0x17   : > { %646 = vmatprep.subr.bf16.mxu0 %v680_v1 }
  0x1a   : > { %647 = vmatpush3.bf16.msra.mxu0 %v667_v7 }
  0xd5   : > { %v394_v9 = vpop.f32.mrf.mxu0 }
  0xd6   : > { %v395_v10 = vadd.f32 %v604_v8, %v394_v9 }
  0xd7   : > { %v634_v11 = vpop.f32.mrf.mxu0 }
  0xd8   : > { %v400_v12 = vpack.c.bf16 %v395_v10, %v395_v10 }
  0xd9   : > { %v397_v13 = vpop.f32.mrf.mxu0 }
  0xda   : > { %641 = vmatmul.mubr.msk.bf16.vlgmr.msra.gmra.mxu1 %vm356_vm1, %v400_v12  ;;  %649 = vmatmul.mubr.msk.bf16.vlgmr.msra.gmra.mxu0 %vm356_vm1, %v400_v12 }
  0xdb   : > { %v635_v14 = vpop.f32.mrf.mxu0 }
 0x19a   : > { %v461_v16 = vpop.f32.mrf.mxu1  ;;  %v524_v18 = vpop.f32.mrf.mxu0 }
 0x19b   : > { %v462_v19 = vadd.f32 %v608_v15, %v461_v16  ;;  %v525_v33 = vadd.f32 %v612_v30, %v524_v18 }
 0x19c   : > { %v642_v20 = vpop.f32.mrf.mxu1  ;;  %v650_v21 = vpop.f32.mrf.mxu0 }
 0x19d   : > { %v532_v22 = vmul.f32 %v531_v17, %v462_v19 }
 0x19e   : > { %v464_v23 = vpop.f32.mrf.mxu1  ;;  %v527_v24 = vpop.f32.mrf.mxu0 }
 0x19f   : > { %v616_v25 = vmul.f32 -1.442695, %v532_v22 }
 0x1a0   : > { %v643_v26 = vpop.f32.mrf.mxu1  ;;  %v651_v27 = vpop.f32.mrf.mxu0 }
 0x1a1   : > { %668 = vpow2.f32 %v616_v25 }
 0x1ae   : > { %v669_v28 = vpop.eup %668 }
 0x1af   : > { %v536_v29 = vadd.f32 1.0, %v669_v28 }
 0x1b1   : > { %670 = vrcp.f32 %v536_v29 }
 0x1be   : > { %v671_v31 = vpop.eup %670 }
 0x1bf   : > { %v539_v32 = vmul.f32 %v671_v31, %v462_v19 }
 0x1c1   : > { %v540_v34 = vmul.f32 %v539_v32, %v525_v33 }
 0x1c3   : > { %v541_v35 = vpack.c.bf16 %v540_v34, %v540_v34 }
 0x1c5   : > { %543 = vst.msk [vmem:[%s330_s15] sm:$0xf] %vm542_vm2, %v541_v35 }
 0x1c6 PF: > { %s22_s10 = sadd.s32 1, %s678_s10  }
 0x1c7   : > { %p19_p4 = scmp.ge.s32.totalorder %s22_s10, 4  }
 0x1c9   :  { %21 = sbr.rel (!%p19_p4) target bundleno = 2 (0x2), region = 86 }

// kernel: llama_forward.6
= control target key start
LH: loop header
LB: loop body
LE: loop exit
PB: predicated region body
PF: predicated region fallthrough
CT: control target
= control target key end

     0   :  { %s956_s24 = smov 0   ;;  %s958_s25 = smov 0   ;;  %s1069_s0 = inlined_call_operand.vmem [shape: bf16[2,8,32], index: 0, kind: input, shape index: {}]   ;;  %s1070_s1 = inlined_call_operand.vmem [shape: bf16[2,32,96], index: 1, kind: input, shape index: {}]   ;;  %s1071_s2 = inlined_call_operand.vmem [shape: bf16[2,32,32], index: 2, kind: input, shape index: {}]   ;;  %s1072_s3 = inlined_call_operand.vmem [shape: f32[1,32], index: 3, kind: input, shape index: {}]   ;;  %s1073_s4 = inlined_call_operand.vmem [shape: f32[8,32], index: 4, kind: input, shape index: {}]   ;;  %s1074_s5 = inlined_call_operand.vmem [shape: f32[8,32], index: 5, kind: input, shape index: {}]   ;;  %s1075_s6 = inlined_call_operand.vmem [shape: f32[8,32], index: 6, kind: input, shape index: {}]   ;;  %s1076_s7 = inlined_call_operand.vmem [shape: bf16[2,8,32], index: 7, kind: output, shape index: {}]  }
   0x1   :  { %s960_s26 = smov 0   ;;  %s962_s27 = smov 0  }
   0x2   :  { %s964_s28 = smov 0  }
   0x3 LB: > { %s26_s29 = sadd.s32 1, %s897_s26  ;;  %s29_s30 = sadd.s32 1, %s901_s27  ;;  %s905_s28 = sphi %s964_s28, %s17_s28   ;;  %s901_s27 = sphi %s962_s27, %s1080_s27   ;;  %s897_s26 = sphi %s960_s26, %s1079_s26   ;;  %s893_s25 = sphi %s958_s25, %s1078_s25   ;;  %s889_s24 = sphi %s956_s24, %s1077_s24  }
   0x4   : > { %p27_p0 = scmp.ge.s32.totalorder %s26_s29, 2  ;;  %p744_p1 = scmp.ge.s32.totalorder %s905_s28, 1 }
   0x5   : > { %p268_p2 = scmp.lt.s32.totalorder %s905_s28, 5 }
   0x6   : > { %s1082_s29 = smov (%p27_p0, %s26_s29), 0  ;;  %s1084_s30 = smov (!%p27_p0, %s29_s30), %s901_s27 }
   0x7   : > { %p269_p3 = pnand %p744_p1, %p268_p2  ;;  %p31_p4 = scmp.ge.s32.totalorder %s1084_s30, 2 }
   0x8   : > { %p308_p5 = scmp.lt.s32.totalorder (!%p269_p3), %s893_s25, 1  ;;  %p312_p6 = scmp.lt.s32.totalorder (!%p269_p3), %s889_s24, 1 }
   0x9   : > { %s1086_s30 = smov (%p31_p4, %s1084_s30), 0  ;;  %272 = sbr.rel (%p269_p3) target bundleno = 1783 (0x6f7), region = 48 }
   0xa   : > { %p751_p7 = scmp.ne.s32.totalorder (!%p269_p3), %s889_s24, 0 }
   0xe   : > { %s1088_s25 = smov (!%p308_p5, %s893_s25), 1 }
   0xf   : > { %s313_s8 = scalar_select %p312_p6, %s889_s24, 1 }
  0x10   : > { %s745_s9 = sshll.u32 %s1088_s25, 2  ;;  %330 = sbr.rel (%p751_p7) target bundleno = 302 (0x12e), region = 52 }
  0x11   : > { %s311_s12 = scalar_lea.vmem %s1069_s0, %s745_s9  ;;  %s764_s13 = sshll.u32 %s313_s8, 4 }
  0x12   : > { %s996_s16 = scalar_lea.vmem %s1070_s1, %s764_s13  ;;  %s1001_s19 = scalar_lea.vmem %s1071_s2, %s764_s13 }
  0x13   : > { %s1006_s22 = scalar_lea.vmem %s1076_s7, %s745_s9 }
  0x15   : > { %v331_v0 = vld [vmem:[%s311_s12] sm:$0xf]  ;;  %vm334_vm0 = vcmask 261120   ;;  %v907_v2 = vmov 0.0  }
  0x16   : > { %v332_v1 = vunpack.c.l.bf16 %v331_v0  ;;  %357 = vst.msk [vmem:[#allocation3] sm:$0xff] %vm334_vm0, %v907_v2  ;;  %v348_v14 = vld [vmem:[%s1075_s6] sm:$0xff] }
  0x18   : > { %v333_v3 = vmul.f32 %v332_v1, %v332_v1 }
  0x1a   : > { %v335_v4 = vsel %vm334_vm0, %v333_v3, 0.0 }
  0x1b   : > { %336 = vadd.xlane.f32.xlu0 %v335_v4 }
  0xa4   : > { %v337_v5 = vpop.xlane.xlu0 %336 }
  0xa5   : > { %v338_v6 = vrot.slane %v337_v5, 4 }
  0xa7   : > { %v339_v7 = vadd.f32 %v338_v6, %v337_v5 }
  0xa9   : > { %v340_v8 = vrot.slane %v339_v7, 2 }
  0xab   : > { %v341_v9 = vadd.f32 %v340_v8, %v339_v7 }
  0xad   : > { %v342_v10 = vrot.slane %v341_v9, 1 }
  0xaf   : > { %v343_v11 = vadd.f32 %v342_v10, %v341_v9 }
  0xb1   : > { %804 = vpush %v343_v11 }
  0xe2   : > { %s805_s23 = spop %804 }
  0xe3   : > { %s347_s25 = smul.f32 0.00390625, %s805_s23 }
  0xe5   : > { %s349_s8 = sadd.f32 1e-12, %s347_s25 }
  0xe7   : > { %v350_v12 = vstv %s349_s8 }
  0xe8   : > { %857 = vrsqrt.f32 %v350_v12 }
  0xf5   : > { %v858_v13 = vpop.eup %857 }
  0xf6   : > { %806 = vpush %v858_v13 }
 0x127   : > { %s807_s9 = spop %806 }
 0x128   : > { %v353_v15 = vstv %s807_s9 }
 0x129   : > { %v354_v16 = vmul.f32 %v353_v15, %v332_v1 }
 0x12b   : > { %v355_v17 = vmul.f32 %v354_v16, %v348_v14 }
 0x12d   : > { %356 = vst.msk [vmem:[#allocation2] sm:$0xff] %vm334_vm0, %v355_v17 }
 0x12e PF: > { %v859_v18 = vld [vmem:[%s996_s16 + $0x8] sm:$0xff]   ;;  %v908_v19 = vmov 0.0   ;;  %v860_v20 = vld [vmem:[%s996_s16] sm:$0xff]   ;;  %vm909_vm1 = vmmov 0   ;;  %s910_s14 = smov 32   ;;  %vm376_vm2 = vcmask 261120   ;;  %v501_v46 = vlaneseq }
 0x12f   : > { %776 = vmatprep.subr.bf16.mxu0 %v908_v19  ;;  %784 = vmatprep.subr.bf16.mxu1 %v908_v19  ;;  %v420_v22 = vld [vmem:[%s1073_s4] sm:$0xff]  ;;  %s911_s15 = smov 112   ;;  %s912_s16 = smov 80   ;;  %vm429_vm3 = vcmask 130048   ;;  %vm507_vm5 = vcmask 64512   ;;  %vm527_vm6 = vcmask 1043456  }
 0x130   : > { %777 = vmatpush3.bf16.msra.mxu0 %v859_v18  ;;  %780 = vmatprep.mubr.msk.bf16.mxu0 %vm909_vm1, %v908_v19  ;;  %v421_v29 = vld [vmem:[%s1074_s5] sm:$0xff]  ;;  %s913_s20 = smov 16   ;;  %s914_s21 = smov 96   ;;  %v502_v47 = vshrl.u32 %v501_v46, 7  ;;  %v504_v48 = vand.u32 127, %v501_v46  ;;  %v861_v0 = vld [vmem:[%s1001_s19 + $0x8] sm:$0xff]  }
 0x131   : > { %778 = vmatprep.subr.bf16.mxu0 %v908_v19  ;;  %439 = vrot.lane.b32.xlu1 %v420_v22, %s910_s14  ;;  %s915_s23 = smov 64   ;;  %v862_v1 = vld [vmem:[%s1001_s19] sm:$0xff]   ;;  %v571_v11 = vld [vmem:[#allocation3] sm:$0xff]  ;;  %p760_p8 = scmp.ne.s32.totalorder %s889_s24, 1 }
 0x132   : > { %786 = vmatprep.mubr.msk.bf16.mxu1 %vm909_vm1, %v908_v19  ;;  %vm505_vm4 = vcmp.le.s32.totalorder %v504_v48, %v502_v47 }
 0x134   : > { %v358_v21 = vld [vmem:[#allocation2] sm:$0xff]  ;;  %779 = vmatpush3.bf16.msra.mxu0 %v860_v20 }
 0x135   : > { %v359_v23 = vpack.c.bf16 %v358_v21, %v358_v21  ;;  %790 = vmatprep.subr.bf16.mxu0 %v908_v19 }
 0x137   : > { %781 = vmatmul.mubr.msk.bf16.vlgmr.msra.gmra.mxu0 %vm376_vm2, %v359_v23 }
 0x138   : > { %792 = vmatprep.mubr.msk.bf16.mxu0 %vm909_vm1, %v908_v19 }
 0x1a3   : > { %v440_v33 = vpop.permute.xlu1 %439 }
 0x1f7   : > { %v414_v24 = vpop.f32.mrf.mxu0 }
 0x1f8   : > { %423 = vrot.lane.b32.xlu0 %v414_v24, %s911_s15  ;;  %v442_v34 = vmul.f32 %v440_v33, %v414_v24  ;;  %v431_v42 = vmul.f32 %v420_v22, %v414_v24  ;;  %v520_v56 = vpack.c.bf16 %v414_v24, %v414_v24 }
 0x1f9   : > { %v782_v25 = vpop.f32.mrf.mxu0 }
 0x1fb   : > { %v417_v26 = vpop.f32.mrf.mxu0 }
 0x1fc   : > { %434 = vrot.lane.b32.xlu0 %v414_v24, %s912_s16 }
 0x1fd   : > { %v783_v27 = vpop.f32.mrf.mxu0 }
 0x26a   : > { %v424_v28 = vpop.permute.xlu0 %423 }
 0x26e   : > { %v435_v30 = vpop.permute.xlu0 %434 }
 0x26f   : > { %v437_v31 = vsel %vm429_vm3, %v435_v30, %v424_v28 }
 0x270   : > { %v443_v32 = vmul.f32 %v437_v31, %v421_v29 }
 0x272   : > { %445 = vrot.lane.b32.xlu1 %v443_v32, %s910_s14 }
 0x276   : > { %426 = vrot.lane.b32.xlu1 %v414_v24, %s913_s20 }
 0x2e4   : > { %v446_v35 = vpop.permute.xlu1 %445 }
 0x2e5   : > { %v448_v36 = vadd.f32 %v446_v35, %v442_v34 }
 0x2e7   : > { %v450_v37 = vpack.c.bf16 %v448_v36, %v448_v36 }
 0x2e8   : > { %v427_v38 = vpop.permute.xlu1 %426 }
 0x2e9   : > { %452 = vrot.lane.b32.xlu0 %v450_v37, %s914_s21  ;;  %v430_v39 = vsel %vm429_vm3, %v424_v28, %v427_v38 }
 0x2ea   : > { %v432_v40 = vmul.f32 %v430_v39, %v421_v29 }
 0x2ec   : > { %v433_v44 = vadd.f32 %v432_v40, %v431_v42 }
 0x2ee   : > { %v449_v45 = vpack.c.bf16 %v433_v44, %v433_v44 }
 0x35b   : > { %v453_v41 = vpop.permute.xlu0 %452 }
 0x35c   : > { %v458_v43 = vsel %vm376_vm2, %v453_v41, 0 }
 0x35d   : > { %785 = vmatpush3.bf16.xpose.msra.mxu1 %v458_v43 }
 0x35e   : > { %796 = vmatprep.subr.bf16.mxu1 %v908_v19 }
 0x364   : > { %787 = vmatmul.mubr.msk.bf16.vlgmr.msra.gmra.mxu1 %vm376_vm2, %v449_v45 }
 0x365   : > { %800 = vmatprep.mubr.msk.bf16.mxu1 %vm909_vm1, %v908_v19  ;;  %797 = vmatpush3.bf16.msra.mxu1 %v861_v0 }
 0x366   : > { %798 = vmatprep.subr.bf16.mxu1 %v908_v19 }
 0x369   : > { %799 = vmatpush3.bf16.msra.mxu1 %v862_v1 }
 0x424   : > { %v494_v49 = vpop.f32.mrf.mxu1 }
 0x425   : > { %v500_v50 = vmul.f32 0.17677669, %v494_v49 }
 0x426   : > { %v788_v51 = vpop.f32.mrf.mxu1 }
 0x427   : > { %v506_v52 = vsel %vm505_vm4, %v500_v50, -1e+30 }
 0x428   : > { %v497_v53 = vpop.f32.mrf.mxu1  ;;  %v508_v54 = vsel %vm507_vm5, %v506_v52, -inf }
 0x429   : > { %509 = vmax.xlane.f32.xlu0 %v508_v54 }
 0x42a   : > { %v789_v55 = vpop.f32.mrf.mxu1 }
 0x43f   : > { %522 = vrot.lane.b32.xlu0 %v520_v56, %s915_s23 }
 0x4b2   : > { %v510_v57 = vpop.xlane.xlu0 %509 }
 0x4b3   : > { %v511_v58 = vsub.f32 %v506_v52, %v510_v57 }
 0x4b5   : > { %v512_v59 = vmul.f32 1.442695, %v511_v58 }
 0x4b6   : > { %v523_v60 = vpop.permute.xlu0 %522 }
 0x4b7   : > { %863 = vpow2.f32 %v512_v59  ;;  %v529_v61 = vsel %vm527_vm6, %v523_v60, 0 }
 0x4b8   : > { %791 = vmatpush3.bf16.msra.mxu0 %v529_v61 }
 0x4c4   : > { %v864_v62 = vpop.eup %863 }
 0x4c5   : > { %v514_v63 = vsel %vm507_vm5, %v864_v62, 0.0 }
 0x4c6   : > { %515 = vadd.xlane.f32.xlu1 %v514_v63 }
 0x54f   : > { %v516_v2 = vpop.xlane.xlu1 %515 }
 0x550   : > { %865 = vrcp.f32 %v516_v2 }
 0x55d   : > { %v866_v3 = vpop.eup %865 }
 0x55e   : > { %v518_v4 = vmul.f32 %v866_v3, %v864_v62 }
 0x560   : > { %v519_v5 = vpack.c.bf16 %v518_v4, %v518_v4 }
 0x562   : > { %793 = vmatmul.mubr.msk.bf16.vlgmr.msra.gmra.mxu0 %vm507_vm5, %v519_v5 }
 0x622   : > { %v565_v6 = vpop.f32.mrf.mxu0 }
 0x623   : > { %v572_v7 = vpack.c.bf16 %v565_v6, %v565_v6 }
 0x624   : > { %v794_v8 = vpop.f32.mrf.mxu0 }
 0x625   : > { %801 = vmatmul.mubr.msk.bf16.vlgmr.msra.gmra.mxu1 %vm376_vm2, %v572_v7 }
 0x626   : > { %v568_v9 = vpop.f32.mrf.mxu0 }
 0x628   : > { %v795_v10 = vpop.f32.mrf.mxu0 }
 0x6e5   : > { %v626_v12 = vpop.f32.mrf.mxu1 }
 0x6e6   : > { %v632_v13 = vadd.f32 %v626_v12, %v571_v11 }
 0x6e7   : > { %v802_v14 = vpop.f32.mrf.mxu1  ;;  %637 = sbr.rel (%p760_p8) target bundleno = 1783 (0x6f7), region = 56 }
 0x6e8   : > { %633 = vst.msk [vmem:[#allocation3] sm:$0xff] %vm376_vm2, %v632_v13 }
 0x6e9   : > { %v629_v15 = vpop.f32.mrf.mxu1 }
 0x6eb   : > { %v803_v16 = vpop.f32.mrf.mxu1 }
 0x6ec   : > { %v638_v17 = vld [vmem:[#allocation2] sm:$0xff]  ;;  %vm650_vm7 = vcmask 257024  }
 0x6ed   : > { %v761_v19 = vld [vmem:[%s1072_s3] ss:$0 sm:$0xff] }
 0x6ef   : > { %v639_v18 = vld [vmem:[#allocation3] sm:$0xff] }
 0x6f0   : > { %v640_v20 = vadd.f32 %v639_v18, %v638_v17 }
 0x6f2   : > { %v648_v21 = vadd.f32 %v761_v19, %v640_v20 }
 0x6f4   : > { %v649_v22 = vpack.c.bf16 %v648_v21, %v648_v21 }
 0x6f6   : > { %651 = vst.msk [vmem:[%s1006_s22] sm:$0xf] %vm650_vm7, %v649_v22 }
 0x6f7 PF: > { %s17_s28 = sadd.s32 1, %s905_s28   ;;  %s1077_s24 = smov %s897_s26 }
 0x6f8   : > { %p14_p9 = scmp.ge.s32.totalorder %s17_s28, 6   ;;  %s1078_s25 = smov %s901_s27 }
 0x6f9   : > { %s1079_s26 = smov %s1082_s29  ;;  %s1080_s27 = smov %s1086_s30 }
 0x6fa   :  { %16 = sbr.rel (!%p14_p9) target bundleno = 3 (0x3), region = 92 }

</bundles_post_ra>
